<compile_context>
chip_gen: v7x
topology: tpu7x:2x2x1
jax: 0.10.0
libtpu: 0.0.40
codegen_flags: <defaults>
</compile_context>

<pallas_src>
import math

import numpy as np
import jax
import jax.numpy as jnp
from jax import lax
from jax.experimental import pallas as pl
from jax.experimental.pallas import tpu as pltpu


def _round_up(x, m):
    return -(-x // m) * m


def _uniform(key, shape, fan_in):
    bound = 1.0 / math.sqrt(fan_in)
    return jax.random.uniform(key, shape, jnp.float32, -bound, bound)


# --------------------------------------------------------------------------
# fused forward kernel builder
# --------------------------------------------------------------------------
def _build_actor_kernel(offsets, *, T, BB, E, H, A, enc_layers, dec_layers,
                        out_lanes):
    """Kernel args: x_ref (BB,T), u_ref (BB,UL), p_ref (slab), out_ref, seq scratch."""

    def kernel(x_ref, u_ref, p_ref, out_ref, seq_ref):

        def P(name):                                  # static slab unpack
            off, rows, cols = offsets[name]
            return p_ref[off:off + rows, :cols]

        def seg_ln_relu(y, gamma, beta, nseg, seg):
            # LayerNorm over each `seg`-lane segment (nseg independent heads),
            # done with lane slices (no minor-dim reshape needed on TPU).
            parts = []
            for s in range(nseg):
                ys = y[:, s * seg:(s + 1) * seg]
                mu = jnp.mean(ys, axis=-1, keepdims=True)
                var = jnp.mean(jnp.square(ys - mu), axis=-1, keepdims=True)
                parts.append((ys - mu) * lax.rsqrt(var + 1e-5))
            yn = parts[0] if nseg == 1 else jnp.concatenate(parts, axis=-1)
            return jnp.maximum(yn * gamma + beta, 0.0)

        # ----------------- GRU encoder (gates packed r|z|n along lanes) ----
        h = jnp.zeros((BB, E), jnp.float32)
        for l in range(enc_layers):
            wih = P(f"gru{l}_wih")      # (din, 3E)
            whh = P(f"gru{l}_whh")      # (E, 3E)
            bih = P(f"gru{l}_bih")      # (1, 3E)
            bhh = P(f"gru{l}_bhh")      # (1, 3E)

            if l == 0:
                gi_all = None           # Din == 1: broadcast multiply per step
            else:
                # hoisted input projection for the whole sequence, one matmul
                gi_all = jnp.dot(seq_ref[...], wih,
                                 preferred_element_type=jnp.float32) + bih

            h = jnp.zeros((BB, E), jnp.float32)
            last = (l == enc_layers - 1)
            # TODO(synk): for long sequences switch this static unroll to
            # lax.fori_loop with gi staged in a VMEM scratch.
            for t in range(T):
                if l == 0:
                    gi = x_ref[:, t:t + 1] * wih + bih          # (BB, 3E)
                else:
                    gi = gi_all[t * BB:(t + 1) * BB, :]          # (BB, 3E)
                gh = jnp.dot(h, whh,
                             preferred_element_type=jnp.float32) + bhh
                r = jax.nn.sigmoid(gi[:, 0:E] + gh[:, 0:E])
                z = jax.nn.sigmoid(gi[:, E:2 * E] + gh[:, E:2 * E])
                n = jnp.tanh(gi[:, 2 * E:3 * E] + r * gh[:, 2 * E:3 * E])
                h = (1.0 - z) * n + z * h
                if not last:
                    seq_ref[t * BB:(t + 1) * BB, :] = h
        emb = h                                                  # (BB, E)

        # ----------------- action decoder MLP ------------------------------
        y = emb
        for i in range(dec_layers + 1):
            y = jnp.dot(y, P(f"dec{i}_w"),
                        preferred_element_type=jnp.float32) + P(f"dec{i}_b")
            if i < dec_layers:
                y = seg_ln_relu(y, P(f"dec{i}_g"), P(f"dec{i}_be"), 1, H)
        logits = y                                               # (BB, A)

        # ----------------- hard gumbel-softmax -----------------------------
        u = u_ref[...]                                           # uniform [0,1)
        gumbel = -jnp.log(-jnp.log(u[:, :A] + 1e-10) + 1e-10)
        # NOTE: (logits+g)/tau scaling dropped — positive scale is
        # argmax-invariant and no soft output is produced (hard=True).
        ysc = logits + gumbel
        col = lax.broadcasted_iota(jnp.int32, ysc.shape, 1)
        is_max = ysc == jnp.max(ysc, axis=-1, keepdims=True)
        first = jnp.min(jnp.where(is_max, col, A), axis=-1, keepdims=True)
        onehot = (col == first).astype(jnp.float32)              # (BB, A)

        # ----------------- arg heads (both heads stacked along lanes) ------
        hk = (jnp.dot(emb, P("head0_we"),
                      preferred_element_type=jnp.float32)
              + jnp.dot(onehot, P("head0_wa"),
                        preferred_element_type=jnp.float32)
              + P("head0_b"))                                    # (BB, 2H)
        hk = seg_ln_relu(hk, P("head0_g"), P("head0_be"), 2, H)
        for m in range(1, dec_layers):
            hk = jnp.dot(hk, P(f"head{m}_w"),                    # block-diag
                         preferred_element_type=jnp.float32) + P(f"head{m}_b")
            hk = seg_ln_relu(hk, P(f"head{m}_g"), P(f"head{m}_be"), 2, H)
        args = jax.nn.sigmoid(
            jnp.dot(hk, P("headL_w"),
                    preferred_element_type=jnp.float32) + P("headL_b"))
        # shared noise for both heads (matches reference); pre-scaled by eps.
        noise = u[:, A:A + 1]
        args = jnp.clip(args + noise, 0.0, 1.0)                  # (BB, 2)

        # ----------------- single lane-dense output store ------------------
        pad = out_lanes - (A + 2)
        pieces = [onehot, args]
        if pad:
            pieces.append(jnp.zeros((BB, pad), jnp.float32))
        out_ref[...] = jnp.concatenate(pieces, axis=-1)

    return kernel


# --------------------------------------------------------------------------
# Actor wrapper
# --------------------------------------------------------------------------
class ActorPallas:
    def __init__(self, key, embedding_dim, hidden_dim, encoder_layers,
                 decoder_layers, num_actions, tau, epsilon,
                 epsilon_decay, epsilon_min):
        self.tau = float(tau)
        self.epsilon = float(epsilon)
        self.epsilon_decay = float(epsilon_decay)
        self.epsilon_min = float(epsilon_min)
        self.embedding_dim = embedding_dim
        self.hidden_dim = hidden_dim
        self.num_actions = num_actions
        self.encoder_layers = encoder_layers
        self.decoder_layers = decoder_layers

        E, H, A = embedding_dim, hidden_dim, num_actions
        assert A + 1 <= 128, "num_actions + noise lane must fit 128 lanes"

        entries = []   # ordered (name, 2-D f32 array)
        k = key

        # ---- GRU (per-layer, gates packed r|z|n along output lanes) ------
        for l in range(encoder_layers):
            din = 1 if l == 0 else E
            k, k1, k2, k3, k4 = jax.random.split(k, 5)
            entries += [
                (f"gru{l}_wih", np.asarray(_uniform(k1, (din, 3 * E), E))),
                (f"gru{l}_whh", np.asarray(_uniform(k2, (E, 3 * E), E))),
                (f"gru{l}_bih", np.asarray(_uniform(k3, (1, 3 * E), E))),
                (f"gru{l}_bhh", np.asarray(_uniform(k4, (1, 3 * E), E))),
            ]

        # ---- action decoder MLP ------------------------------------------
        dims = [E] + [H] * decoder_layers + [A]
        for i in range(len(dims) - 1):
            k, kw, kb = jax.random.split(k, 3)
            din, dout = dims[i], dims[i + 1]
            entries += [(f"dec{i}_w", np.asarray(_uniform(kw, (din, dout), din))),
                        (f"dec{i}_b", np.asarray(_uniform(kb, (1, dout), din)))]
            if i < len(dims) - 2:
                entries += [(f"dec{i}_g", np.ones((1, dout), np.float32)),
                            (f"dec{i}_be", np.zeros((1, dout), np.float32))]

        # ---- arg heads: two heads stacked along output lanes -------------
        h_in = E + A
        w0, b0 = [], []
        for _ in range(2):
            k, kw, kb = jax.random.split(k, 3)
            w0.append(np.asarray(_uniform(kw, (h_in, H), h_in)))
            b0.append(np.asarray(_uniform(kb, (1, H), h_in)))
        entries += [
            ("head0_we", np.concatenate([w0[0][:E], w0[1][:E]], axis=1)),   # (E,2H)
            ("head0_wa", np.concatenate([w0[0][E:], w0[1][E:]], axis=1)),   # (A,2H)
            ("head0_b", np.concatenate(b0, axis=1)),                        # (1,2H)
            ("head0_g", np.ones((1, 2 * H), np.float32)),
            ("head0_be", np.zeros((1, 2 * H), np.float32)),
        ]
        for m in range(1, decoder_layers):          # block-diagonal hidden layers
            wbd = np.zeros((2 * H, 2 * H), np.float32)
            bs = []
            for kk in range(2):
                k, kw, kb = jax.random.split(k, 3)
                wbd[kk * H:(kk + 1) * H, kk * H:(kk + 1) * H] = \
                    np.asarray(_uniform(kw, (H, H), H))
                bs.append(np.asarray(_uniform(kb, (1, H), H)))
            entries += [(f"head{m}_w", wbd),
                        (f"head{m}_b", np.concatenate(bs, axis=1)),
                        (f"head{m}_g", np.ones((1, 2 * H), np.float32)),
                        (f"head{m}_be", np.zeros((1, 2 * H), np.float32))]
        wl = np.zeros((2 * H, 2), np.float32)        # final: (2H, 2)
        bl = np.zeros((1, 2), np.float32)
        for kk in range(2):
            k, kw, kb = jax.random.split(k, 3)
            wl[kk * H:(kk + 1) * H, kk] = np.asarray(_uniform(kw, (H, 1), H))[:, 0]
            bl[0, kk] = float(np.asarray(_uniform(kb, (1, 1), H))[0, 0])
        entries += [("headL_w", wl), ("headL_b", bl)]

        # ---- pack everything into one lane-padded slab --------------------
        max_cols = max(arr.shape[1] for _, arr in entries)
        lanes = _round_up(max_cols, 128)
        offsets, off = {}, 0
        for name, arr in entries:
            rows, cols = arr.shape
            offsets[name] = (off, rows, cols)
            off += _round_up(rows, 8)
        rows_total = _round_up(off, 8)
        slab = np.zeros((rows_total, lanes), np.float32)
        for name, arr in entries:
            o, r, c = offsets[name]
            slab[o:o + r, :c] = arr
        self._slab = jnp.asarray(slab)
        self._offsets = offsets

        self._forward_jit = jax.jit(self._forward)

    # ------------------------------------------------------------------
    def _forward(self, state, slab, key, eps):
        B, T, _ = state.shape
        E, H, A = self.embedding_dim, self.hidden_dim, self.num_actions

        BB = min(128, _round_up(B, 8))        # batch tile up to MXU height
        B_pad = _round_up(B, BB)

        x = state[..., 0].astype(jnp.float32)                 # (B, T) dense
        if B_pad != B:
            x = jnp.pad(x, ((0, B_pad - B), (0, 0)))

        u_lanes = _round_up(A + 1, 128)
        u = jax.random.uniform(key, (B_pad, u_lanes), jnp.float32)
        u = u.at[:, A].multiply(eps)          # shared arg-head noise, pre-scaled

        out_lanes = _round_up(A + 2, 128)
        kernel = _build_actor_kernel(
            self._offsets, T=T, BB=BB, E=E, H=H, A=A,
            enc_layers=self.encoder_layers, dec_layers=self.decoder_layers,
            out_lanes=out_lanes)
        R, L = slab.shape

        out = pl.pallas_call(
            kernel,
            grid=(B_pad // BB,),
            in_specs=[
                pl.BlockSpec((BB, T), lambda i: (i, 0)),          # state
                pl.BlockSpec((BB, u_lanes), lambda i: (i, 0)),    # uniform noise
                pl.BlockSpec((R, L), lambda i: (0, 0)),           # param slab
            ],
            out_specs=pl.BlockSpec((BB, out_lanes), lambda i: (i, 0)),
            out_shape=jax.ShapeDtypeStruct((B_pad, out_lanes), jnp.float32),
            scratch_shapes=[pltpu.VMEM((T * BB, E), jnp.float32)],
            compiler_params=pltpu.CompilerParams(
                dimension_semantics=("parallel",),
                vmem_limit_bytes=32 * 1024 * 1024),
        )(x, u, slab)

        onehot = out[:B, :A]
        arg1 = out[:B, A:A + 1]
        arg2 = out[:B, A + 1:A + 2]
        return onehot, arg1, arg2

    # ------------------------------------------------------------------
    def __call__(self, state, rng):
        eps = jnp.float32(self.epsilon)
        return self._forward_jit(jnp.asarray(state), self._slab, rng, eps)

    def anneal(self):
        if self.epsilon > self.epsilon_min:
            self.epsilon *= self.epsilon_decay


# --------------------------------------------------------------------------
if __name__ == "__main__":
    key = jax.random.PRNGKey(0)
    k_params, k_state, k_fwd = jax.random.split(key, 3)

    # Small, shape-consistent config (state is (B, T, 1) as in the reference).
    B, T = 2, 8
    embedding_dim = 32
    hidden_dim = 32
    encoder_layers = 2
    decoder_layers = 2
    num_actions = 8

    actor = ActorPallas(k_params, embedding_dim, hidden_dim, encoder_layers,
                        decoder_layers, num_actions,
                        tau=1.0, epsilon=0.1, epsilon_decay=0.99,
                        epsilon_min=0.01)

    state = jax.random.normal(k_state, (B, T, 1), jnp.float32)

    action_one_hot, arg1, arg2 = actor(state, k_fwd)
    jax.block_until_ready((action_one_hot, arg1, arg2))

    assert action_one_hot.shape == (B, num_actions)
    assert arg1.shape == (B, 1) and arg2.shape == (B, 1)
    # each row of the hard gumbel-softmax output is exactly one-hot
    assert bool(jnp.all(jnp.sum(action_one_hot, axis=-1) == 1.0))
    assert bool(jnp.all((action_one_hot == 0.0) | (action_one_hot == 1.0)))
    assert bool(jnp.all((arg1 >= 0.0) & (arg1 <= 1.0)))
    assert bool(jnp.all((arg2 >= 0.0) & (arg2 <= 1.0)))

    # TODO(synk): straight-through (soft) gradient path of F.gumbel_softmax is
    # not implemented — forward-only hard one-hot, fine for inference.
    print("KERNEL_OK")
</pallas_src>

<mosaic_0001>
module attributes {stable_mosaic.version = 11 : i64} {
  func.func @kernel(%arg0: i32, %arg1: memref<8x8xf32, #tpu.memory_space<vmem>>, %arg2: memref<8x128xf32, #tpu.memory_space<vmem>>, %arg3: memref<512x128xf32, #tpu.memory_space<vmem>>, %arg4: memref<8x128xf32, #tpu.memory_space<vmem>>, %arg5: memref<64x32xf32, #tpu.memory_space<vmem>>) attributes {dimension_semantics = [#tpu.dimension_semantics<parallel>], iteration_bounds = array<i64: 1>, scalar_prefetch = 0 : i64, scratch_operands = 1 : i64, tpu.core_type = #tpu.core_type<tc>, window_params = [{transform_indices = @transform_0, window_bounds = array<i64: 8, 8>}, {transform_indices = @transform_1, window_bounds = array<i64: 8, 128>}, {pipeline_mode = #tpu.pipeline_mode<synchronous>, transform_indices = @transform_2, window_bounds = array<i64: 512, 128>}, {transform_indices = @transform_3, window_bounds = array<i64: 8, 128>}]} {
    %c0 = arith.constant 0 : index
    %c0_0 = arith.constant 0 : index
    %0 = vector.load %arg3[%c0, %c0_0] : memref<512x128xf32, #tpu.memory_space<vmem>>, vector<1x96xf32>
    %c8 = arith.constant 8 : index
    %c0_1 = arith.constant 0 : index
    %1 = vector.load %arg3[%c8, %c0_1] : memref<512x128xf32, #tpu.memory_space<vmem>>, vector<32x96xf32>
    %c40 = arith.constant 40 : index
    %c0_2 = arith.constant 0 : index
    %2 = vector.load %arg3[%c40, %c0_2] : memref<512x128xf32, #tpu.memory_space<vmem>>, vector<1x96xf32>
    %c48 = arith.constant 48 : index
    %c0_3 = arith.constant 0 : index
    %3 = vector.load %arg3[%c48, %c0_3] : memref<512x128xf32, #tpu.memory_space<vmem>>, vector<1x96xf32>
    %cst = arith.constant 0.000000e+00 : f32
    %4 = vector.broadcast %cst : f32 to vector<8x32xf32>
    %c0_4 = arith.constant 0 : index
    %c0_5 = arith.constant 0 : index
    %5 = vector.load %arg1[%c0_4, %c0_5] : memref<8x8xf32, #tpu.memory_space<vmem>>, vector<8x1xf32>
    %6 = vector.broadcast %5 : vector<8x1xf32> to vector<8x96xf32>
    %7 = vector.broadcast %0 : vector<1x96xf32> to vector<8x96xf32>
    %8 = arith.mulf %6, %7 : vector<8x96xf32>
    %9 = vector.broadcast %2 : vector<1x96xf32> to vector<8x96xf32>
    %10 = arith.addf %8, %9 : vector<8x96xf32>
    %cst_6 = arith.constant dense<0.000000e+00> : vector<8x96xf32>
    %11 = tpu.matmul %4, %1, %cst_6 {dimension_numbers = #tpu.dot_dimension_numbers<[1], [0], [0], [1], [0, 0, 1, 1], [], []>} : vector<8x32xf32>, vector<32x96xf32>, vector<8x96xf32> -> vector<8x96xf32>
    %12 = vector.broadcast %3 : vector<1x96xf32> to vector<8x96xf32>
    %13 = arith.addf %11, %12 : vector<8x96xf32>
    %14 = vector.extract_strided_slice %10 {offsets = [0, 0], sizes = [8, 32], strides = [1, 1]} : vector<8x96xf32> to vector<8x32xf32>
    %15 = vector.extract_strided_slice %13 {offsets = [0, 0], sizes = [8, 32], strides = [1, 1]} : vector<8x96xf32> to vector<8x32xf32>
    %16 = arith.addf %14, %15 : vector<8x32xf32>
    %17 = arith.negf %16 : vector<8x32xf32>
    %18 = math.exp %17 : vector<8x32xf32>
    %cst_7 = arith.constant 1.000000e+00 : f32
    %19 = vector.broadcast %cst_7 : f32 to vector<8x32xf32>
    %20 = arith.addf %19, %18 : vector<8x32xf32>
    %21 = arith.divf %19, %20 : vector<8x32xf32>
    %22 = vector.extract_strided_slice %10 {offsets = [0, 32], sizes = [8, 32], strides = [1, 1]} : vector<8x96xf32> to vector<8x32xf32>
    %23 = vector.extract_strided_slice %13 {offsets = [0, 32], sizes = [8, 32], strides = [1, 1]} : vector<8x96xf32> to vector<8x32xf32>
    %24 = arith.addf %22, %23 : vector<8x32xf32>
    %25 = arith.negf %24 : vector<8x32xf32>
    %26 = math.exp %25 : vector<8x32xf32>
    %cst_8 = arith.constant 1.000000e+00 : f32
    %27 = vector.broadcast %cst_8 : f32 to vector<8x32xf32>
    %28 = arith.addf %27, %26 : vector<8x32xf32>
    %29 = arith.divf %27, %28 : vector<8x32xf32>
    %30 = vector.extract_strided_slice %10 {offsets = [0, 64], sizes = [8, 32], strides = [1, 1]} : vector<8x96xf32> to vector<8x32xf32>
    %31 = vector.extract_strided_slice %13 {offsets = [0, 64], sizes = [8, 32], strides = [1, 1]} : vector<8x96xf32> to vector<8x32xf32>
    %32 = arith.mulf %21, %31 : vector<8x32xf32>
    %33 = arith.addf %30, %32 : vector<8x32xf32>
    %34 = math.tanh %33 : vector<8x32xf32>
    %cst_9 = arith.constant 1.000000e+00 : f32
    %35 = vector.broadcast %cst_9 : f32 to vector<8x32xf32>
    %36 = arith.subf %35, %29 : vector<8x32xf32>
    %37 = arith.mulf %36, %34 : vector<8x32xf32>
    %38 = arith.mulf %29, %4 : vector<8x32xf32>
    %39 = arith.addf %37, %38 : vector<8x32xf32>
    %c0_10 = arith.constant 0 : index
    %c0_11 = arith.constant 0 : index
    %40 = vector.load %arg5[%c0_10, %c0_11] : memref<64x32xf32, #tpu.memory_space<vmem>>, vector<8x32xf32>
    tpu.vector_store %arg5[%c0_10, %c0_11], %39 {strides = array<i32>} : memref<64x32xf32, #tpu.memory_space<vmem>>, vector<8x32xf32>,
    %c0_12 = arith.constant 0 : index
    %c1 = arith.constant 1 : index
    %41 = vector.load %arg1[%c0_12, %c1] : memref<8x8xf32, #tpu.memory_space<vmem>>, vector<8x1xf32>
    %42 = vector.broadcast %41 : vector<8x1xf32> to vector<8x96xf32>
    %43 = vector.broadcast %0 : vector<1x96xf32> to vector<8x96xf32>
    %44 = arith.mulf %42, %43 : vector<8x96xf32>
    %45 = vector.broadcast %2 : vector<1x96xf32> to vector<8x96xf32>
    %46 = arith.addf %44, %45 : vector<8x96xf32>
    %cst_13 = arith.constant dense<0.000000e+00> : vector<8x96xf32>
    %47 = tpu.matmul %39, %1, %cst_13 {dimension_numbers = #tpu.dot_dimension_numbers<[1], [0], [0], [1], [0, 0, 1, 1], [], []>} : vector<8x32xf32>, vector<32x96xf32>, vector<8x96xf32> -> vector<8x96xf32>
    %48 = vector.broadcast %3 : vector<1x96xf32> to vector<8x96xf32>
    %49 = arith.addf %47, %48 : vector<8x96xf32>
    %50 = vector.extract_strided_slice %46 {offsets = [0, 0], sizes = [8, 32], strides = [1, 1]} : vector<8x96xf32> to vector<8x32xf32>
    %51 = vector.extract_strided_slice %49 {offsets = [0, 0], sizes = [8, 32], strides = [1, 1]} : vector<8x96xf32> to vector<8x32xf32>
    %52 = arith.addf %50, %51 : vector<8x32xf32>
    %53 = arith.negf %52 : vector<8x32xf32>
    %54 = math.exp %53 : vector<8x32xf32>
    %cst_14 = arith.constant 1.000000e+00 : f32
    %55 = vector.broadcast %cst_14 : f32 to vector<8x32xf32>
    %56 = arith.addf %55, %54 : vector<8x32xf32>
    %57 = arith.divf %55, %56 : vector<8x32xf32>
    %58 = vector.extract_strided_slice %46 {offsets = [0, 32], sizes = [8, 32], strides = [1, 1]} : vector<8x96xf32> to vector<8x32xf32>
    %59 = vector.extract_strided_slice %49 {offsets = [0, 32], sizes = [8, 32], strides = [1, 1]} : vector<8x96xf32> to vector<8x32xf32>
    %60 = arith.addf %58, %59 : vector<8x32xf32>
    %61 = arith.negf %60 : vector<8x32xf32>
    %62 = math.exp %61 : vector<8x32xf32>
    %cst_15 = arith.constant 1.000000e+00 : f32
    %63 = vector.broadcast %cst_15 : f32 to vector<8x32xf32>
    %64 = arith.addf %63, %62 : vector<8x32xf32>
    %65 = arith.divf %63, %64 : vector<8x32xf32>
    %66 = vector.extract_strided_slice %46 {offsets = [0, 64], sizes = [8, 32], strides = [1, 1]} : vector<8x96xf32> to vector<8x32xf32>
    %67 = vector.extract_strided_slice %49 {offsets = [0, 64], sizes = [8, 32], strides = [1, 1]} : vector<8x96xf32> to vector<8x32xf32>
    %68 = arith.mulf %57, %67 : vector<8x32xf32>
    %69 = arith.addf %66, %68 : vector<8x32xf32>
    %70 = math.tanh %69 : vector<8x32xf32>
    %cst_16 = arith.constant 1.000000e+00 : f32
    %71 = vector.broadcast %cst_16 : f32 to vector<8x32xf32>
    %72 = arith.subf %71, %65 : vector<8x32xf32>
    %73 = arith.mulf %72, %70 : vector<8x32xf32>
    %74 = arith.mulf %65, %39 : vector<8x32xf32>
    %75 = arith.addf %73, %74 : vector<8x32xf32>
    %c8_17 = arith.constant 8 : index
    %c0_18 = arith.constant 0 : index
    %76 = vector.load %arg5[%c8_17, %c0_18] : memref<64x32xf32, #tpu.memory_space<vmem>>, vector<8x32xf32>
    tpu.vector_store %arg5[%c8_17, %c0_18], %75 {strides = array<i32>} : memref<64x32xf32, #tpu.memory_space<vmem>>, vector<8x32xf32>,
    %c0_19 = arith.constant 0 : index
    %c2 = arith.constant 2 : index
    %77 = vector.load %arg1[%c0_19, %c2] : memref<8x8xf32, #tpu.memory_space<vmem>>, vector<8x1xf32>
    %78 = vector.broadcast %77 : vector<8x1xf32> to vector<8x96xf32>
    %79 = vector.broadcast %0 : vector<1x96xf32> to vector<8x96xf32>
    %80 = arith.mulf %78, %79 : vector<8x96xf32>
    %81 = vector.broadcast %2 : vector<1x96xf32> to vector<8x96xf32>
    %82 = arith.addf %80, %81 : vector<8x96xf32>
    %cst_20 = arith.constant dense<0.000000e+00> : vector<8x96xf32>
    %83 = tpu.matmul %75, %1, %cst_20 {dimension_numbers = #tpu.dot_dimension_numbers<[1], [0], [0], [1], [0, 0, 1, 1], [], []>} : vector<8x32xf32>, vector<32x96xf32>, vector<8x96xf32> -> vector<8x96xf32>
    %84 = vector.broadcast %3 : vector<1x96xf32> to vector<8x96xf32>
    %85 = arith.addf %83, %84 : vector<8x96xf32>
    %86 = vector.extract_strided_slice %82 {offsets = [0, 0], sizes = [8, 32], strides = [1, 1]} : vector<8x96xf32> to vector<8x32xf32>
    %87 = vector.extract_strided_slice %85 {offsets = [0, 0], sizes = [8, 32], strides = [1, 1]} : vector<8x96xf32> to vector<8x32xf32>
    %88 = arith.addf %86, %87 : vector<8x32xf32>
    %89 = arith.negf %88 : vector<8x32xf32>
    %90 = math.exp %89 : vector<8x32xf32>
    %cst_21 = arith.constant 1.000000e+00 : f32
    %91 = vector.broadcast %cst_21 : f32 to vector<8x32xf32>
    %92 = arith.addf %91, %90 : vector<8x32xf32>
    %93 = arith.divf %91, %92 : vector<8x32xf32>
    %94 = vector.extract_strided_slice %82 {offsets = [0, 32], sizes = [8, 32], strides = [1, 1]} : vector<8x96xf32> to vector<8x32xf32>
    %95 = vector.extract_strided_slice %85 {offsets = [0, 32], sizes = [8, 32], strides = [1, 1]} : vector<8x96xf32> to vector<8x32xf32>
    %96 = arith.addf %94, %95 : vector<8x32xf32>
    %97 = arith.negf %96 : vector<8x32xf32>
    %98 = math.exp %97 : vector<8x32xf32>
    %cst_22 = arith.constant 1.000000e+00 : f32
    %99 = vector.broadcast %cst_22 : f32 to vector<8x32xf32>
    %100 = arith.addf %99, %98 : vector<8x32xf32>
    %101 = arith.divf %99, %100 : vector<8x32xf32>
    %102 = vector.extract_strided_slice %82 {offsets = [0, 64], sizes = [8, 32], strides = [1, 1]} : vector<8x96xf32> to vector<8x32xf32>
    %103 = vector.extract_strided_slice %85 {offsets = [0, 64], sizes = [8, 32], strides = [1, 1]} : vector<8x96xf32> to vector<8x32xf32>
    %104 = arith.mulf %93, %103 : vector<8x32xf32>
    %105 = arith.addf %102, %104 : vector<8x32xf32>
    %106 = math.tanh %105 : vector<8x32xf32>
    %cst_23 = arith.constant 1.000000e+00 : f32
    %107 = vector.broadcast %cst_23 : f32 to vector<8x32xf32>
    %108 = arith.subf %107, %101 : vector<8x32xf32>
    %109 = arith.mulf %108, %106 : vector<8x32xf32>
    %110 = arith.mulf %101, %75 : vector<8x32xf32>
    %111 = arith.addf %109, %110 : vector<8x32xf32>
    %c16 = arith.constant 16 : index
    %c0_24 = arith.constant 0 : index
    %112 = vector.load %arg5[%c16, %c0_24] : memref<64x32xf32, #tpu.memory_space<vmem>>, vector<8x32xf32>
    tpu.vector_store %arg5[%c16, %c0_24], %111 {strides = array<i32>} : memref<64x32xf32, #tpu.memory_space<vmem>>, vector<8x32xf32>,
    %c0_25 = arith.constant 0 : index
    %c3 = arith.constant 3 : index
    %113 = vector.load %arg1[%c0_25, %c3] : memref<8x8xf32, #tpu.memory_space<vmem>>, vector<8x1xf32>
    %114 = vector.broadcast %113 : vector<8x1xf32> to vector<8x96xf32>
    %115 = vector.broadcast %0 : vector<1x96xf32> to vector<8x96xf32>
    %116 = arith.mulf %114, %115 : vector<8x96xf32>
    %117 = vector.broadcast %2 : vector<1x96xf32> to vector<8x96xf32>
    %118 = arith.addf %116, %117 : vector<8x96xf32>
    %cst_26 = arith.constant dense<0.000000e+00> : vector<8x96xf32>
    %119 = tpu.matmul %111, %1, %cst_26 {dimension_numbers = #tpu.dot_dimension_numbers<[1], [0], [0], [1], [0, 0, 1, 1], [], []>} : vector<8x32xf32>, vector<32x96xf32>, vector<8x96xf32> -> vector<8x96xf32>
    %120 = vector.broadcast %3 : vector<1x96xf32> to vector<8x96xf32>
    %121 = arith.addf %119, %120 : vector<8x96xf32>
    %122 = vector.extract_strided_slice %118 {offsets = [0, 0], sizes = [8, 32], strides = [1, 1]} : vector<8x96xf32> to vector<8x32xf32>
    %123 = vector.extract_strided_slice %121 {offsets = [0, 0], sizes = [8, 32], strides = [1, 1]} : vector<8x96xf32> to vector<8x32xf32>
    %124 = arith.addf %122, %123 : vector<8x32xf32>
    %125 = arith.negf %124 : vector<8x32xf32>
    %126 = math.exp %125 : vector<8x32xf32>
    %cst_27 = arith.constant 1.000000e+00 : f32
    %127 = vector.broadcast %cst_27 : f32 to vector<8x32xf32>
    %128 = arith.addf %127, %126 : vector<8x32xf32>
    %129 = arith.divf %127, %128 : vector<8x32xf32>
    %130 = vector.extract_strided_slice %118 {offsets = [0, 32], sizes = [8, 32], strides = [1, 1]} : vector<8x96xf32> to vector<8x32xf32>
    %131 = vector.extract_strided_slice %121 {offsets = [0, 32], sizes = [8, 32], strides = [1, 1]} : vector<8x96xf32> to vector<8x32xf32>
    %132 = arith.addf %130, %131 : vector<8x32xf32>
    %133 = arith.negf %132 : vector<8x32xf32>
    %134 = math.exp %133 : vector<8x32xf32>
    %cst_28 = arith.constant 1.000000e+00 : f32
    %135 = vector.broadcast %cst_28 : f32 to vector<8x32xf32>
    %136 = arith.addf %135, %134 : vector<8x32xf32>
    %137 = arith.divf %135, %136 : vector<8x32xf32>
    %138 = vector.extract_strided_slice %118 {offsets = [0, 64], sizes = [8, 32], strides = [1, 1]} : vector<8x96xf32> to vector<8x32xf32>
    %139 = vector.extract_strided_slice %121 {offsets = [0, 64], sizes = [8, 32], strides = [1, 1]} : vector<8x96xf32> to vector<8x32xf32>
    %140 = arith.mulf %129, %139 : vector<8x32xf32>
    %141 = arith.addf %138, %140 : vector<8x32xf32>
    %142 = math.tanh %141 : vector<8x32xf32>
    %cst_29 = arith.constant 1.000000e+00 : f32
    %143 = vector.broadcast %cst_29 : f32 to vector<8x32xf32>
    %144 = arith.subf %143, %137 : vector<8x32xf32>
    %145 = arith.mulf %144, %142 : vector<8x32xf32>
    %146 = arith.mulf %137, %111 : vector<8x32xf32>
    %147 = arith.addf %145, %146 : vector<8x32xf32>
    %c24 = arith.constant 24 : index
    %c0_30 = arith.constant 0 : index
    %148 = vector.load %arg5[%c24, %c0_30] : memref<64x32xf32, #tpu.memory_space<vmem>>, vector<8x32xf32>
    tpu.vector_store %arg5[%c24, %c0_30], %147 {strides = array<i32>} : memref<64x32xf32, #tpu.memory_space<vmem>>, vector<8x32xf32>,
    %c0_31 = arith.constant 0 : index
    %c4 = arith.constant 4 : index
    %149 = vector.load %arg1[%c0_31, %c4] : memref<8x8xf32, #tpu.memory_space<vmem>>, vector<8x1xf32>
    %150 = vector.broadcast %149 : vector<8x1xf32> to vector<8x96xf32>
    %151 = vector.broadcast %0 : vector<1x96xf32> to vector<8x96xf32>
    %152 = arith.mulf %150, %151 : vector<8x96xf32>
    %153 = vector.broadcast %2 : vector<1x96xf32> to vector<8x96xf32>
    %154 = arith.addf %152, %153 : vector<8x96xf32>
    %cst_32 = arith.constant dense<0.000000e+00> : vector<8x96xf32>
    %155 = tpu.matmul %147, %1, %cst_32 {dimension_numbers = #tpu.dot_dimension_numbers<[1], [0], [0], [1], [0, 0, 1, 1], [], []>} : vector<8x32xf32>, vector<32x96xf32>, vector<8x96xf32> -> vector<8x96xf32>
    %156 = vector.broadcast %3 : vector<1x96xf32> to vector<8x96xf32>
    %157 = arith.addf %155, %156 : vector<8x96xf32>
    %158 = vector.extract_strided_slice %154 {offsets = [0, 0], sizes = [8, 32], strides = [1, 1]} : vector<8x96xf32> to vector<8x32xf32>
    %159 = vector.extract_strided_slice %157 {offsets = [0, 0], sizes = [8, 32], strides = [1, 1]} : vector<8x96xf32> to vector<8x32xf32>
    %160 = arith.addf %158, %159 : vector<8x32xf32>
    %161 = arith.negf %160 : vector<8x32xf32>
    %162 = math.exp %161 : vector<8x32xf32>
    %cst_33 = arith.constant 1.000000e+00 : f32
    %163 = vector.broadcast %cst_33 : f32 to vector<8x32xf32>
    %164 = arith.addf %163, %162 : vector<8x32xf32>
    %165 = arith.divf %163, %164 : vector<8x32xf32>
    %166 = vector.extract_strided_slice %154 {offsets = [0, 32], sizes = [8, 32], strides = [1, 1]} : vector<8x96xf32> to vector<8x32xf32>
    %167 = vector.extract_strided_slice %157 {offsets = [0, 32], sizes = [8, 32], strides = [1, 1]} : vector<8x96xf32> to vector<8x32xf32>
    %168 = arith.addf %166, %167 : vector<8x32xf32>
    %169 = arith.negf %168 : vector<8x32xf32>
    %170 = math.exp %169 : vector<8x32xf32>
    %cst_34 = arith.constant 1.000000e+00 : f32
    %171 = vector.broadcast %cst_34 : f32 to vector<8x32xf32>
    %172 = arith.addf %171, %170 : vector<8x32xf32>
    %173 = arith.divf %171, %172 : vector<8x32xf32>
    %174 = vector.extract_strided_slice %154 {offsets = [0, 64], sizes = [8, 32], strides = [1, 1]} : vector<8x96xf32> to vector<8x32xf32>
    %175 = vector.extract_strided_slice %157 {offsets = [0, 64], sizes = [8, 32], strides = [1, 1]} : vector<8x96xf32> to vector<8x32xf32>
    %176 = arith.mulf %165, %175 : vector<8x32xf32>
    %177 = arith.addf %174, %176 : vector<8x32xf32>
    %178 = math.tanh %177 : vector<8x32xf32>
    %cst_35 = arith.constant 1.000000e+00 : f32
    %179 = vector.broadcast %cst_35 : f32 to vector<8x32xf32>
    %180 = arith.subf %179, %173 : vector<8x32xf32>
    %181 = arith.mulf %180, %178 : vector<8x32xf32>
    %182 = arith.mulf %173, %147 : vector<8x32xf32>
    %183 = arith.addf %181, %182 : vector<8x32xf32>
    %c32 = arith.constant 32 : index
    %c0_36 = arith.constant 0 : index
    %184 = vector.load %arg5[%c32, %c0_36] : memref<64x32xf32, #tpu.memory_space<vmem>>, vector<8x32xf32>
    tpu.vector_store %arg5[%c32, %c0_36], %183 {strides = array<i32>} : memref<64x32xf32, #tpu.memory_space<vmem>>, vector<8x32xf32>,
    %c0_37 = arith.constant 0 : index
    %c5 = arith.constant 5 : index
    %185 = vector.load %arg1[%c0_37, %c5] : memref<8x8xf32, #tpu.memory_space<vmem>>, vector<8x1xf32>
    %186 = vector.broadcast %185 : vector<8x1xf32> to vector<8x96xf32>
    %187 = vector.broadcast %0 : vector<1x96xf32> to vector<8x96xf32>
    %188 = arith.mulf %186, %187 : vector<8x96xf32>
    %189 = vector.broadcast %2 : vector<1x96xf32> to vector<8x96xf32>
    %190 = arith.addf %188, %189 : vector<8x96xf32>
    %cst_38 = arith.constant dense<0.000000e+00> : vector<8x96xf32>
    %191 = tpu.matmul %183, %1, %cst_38 {dimension_numbers = #tpu.dot_dimension_numbers<[1], [0], [0], [1], [0, 0, 1, 1], [], []>} : vector<8x32xf32>, vector<32x96xf32>, vector<8x96xf32> -> vector<8x96xf32>
    %192 = vector.broadcast %3 : vector<1x96xf32> to vector<8x96xf32>
    %193 = arith.addf %191, %192 : vector<8x96xf32>
    %194 = vector.extract_strided_slice %190 {offsets = [0, 0], sizes = [8, 32], strides = [1, 1]} : vector<8x96xf32> to vector<8x32xf32>
    %195 = vector.extract_strided_slice %193 {offsets = [0, 0], sizes = [8, 32], strides = [1, 1]} : vector<8x96xf32> to vector<8x32xf32>
    %196 = arith.addf %194, %195 : vector<8x32xf32>
    %197 = arith.negf %196 : vector<8x32xf32>
    %198 = math.exp %197 : vector<8x32xf32>
    %cst_39 = arith.constant 1.000000e+00 : f32
    %199 = vector.broadcast %cst_39 : f32 to vector<8x32xf32>
    %200 = arith.addf %199, %198 : vector<8x32xf32>
    %201 = arith.divf %199, %200 : vector<8x32xf32>
    %202 = vector.extract_strided_slice %190 {offsets = [0, 32], sizes = [8, 32], strides = [1, 1]} : vector<8x96xf32> to vector<8x32xf32>
    %203 = vector.extract_strided_slice %193 {offsets = [0, 32], sizes = [8, 32], strides = [1, 1]} : vector<8x96xf32> to vector<8x32xf32>
    %204 = arith.addf %202, %203 : vector<8x32xf32>
    %205 = arith.negf %204 : vector<8x32xf32>
    %206 = math.exp %205 : vector<8x32xf32>
    %cst_40 = arith.constant 1.000000e+00 : f32
    %207 = vector.broadcast %cst_40 : f32 to vector<8x32xf32>
    %208 = arith.addf %207, %206 : vector<8x32xf32>
    %209 = arith.divf %207, %208 : vector<8x32xf32>
    %210 = vector.extract_strided_slice %190 {offsets = [0, 64], sizes = [8, 32], strides = [1, 1]} : vector<8x96xf32> to vector<8x32xf32>
    %211 = vector.extract_strided_slice %193 {offsets = [0, 64], sizes = [8, 32], strides = [1, 1]} : vector<8x96xf32> to vector<8x32xf32>
    %212 = arith.mulf %201, %211 : vector<8x32xf32>
    %213 = arith.addf %210, %212 : vector<8x32xf32>
    %214 = math.tanh %213 : vector<8x32xf32>
    %cst_41 = arith.constant 1.000000e+00 : f32
    %215 = vector.broadcast %cst_41 : f32 to vector<8x32xf32>
    %216 = arith.subf %215, %209 : vector<8x32xf32>
    %217 = arith.mulf %216, %214 : vector<8x32xf32>
    %218 = arith.mulf %209, %183 : vector<8x32xf32>
    %219 = arith.addf %217, %218 : vector<8x32xf32>
    %c40_42 = arith.constant 40 : index
    %c0_43 = arith.constant 0 : index
    %220 = vector.load %arg5[%c40_42, %c0_43] : memref<64x32xf32, #tpu.memory_space<vmem>>, vector<8x32xf32>
    tpu.vector_store %arg5[%c40_42, %c0_43], %219 {strides = array<i32>} : memref<64x32xf32, #tpu.memory_space<vmem>>, vector<8x32xf32>,
    %c0_44 = arith.constant 0 : index
    %c6 = arith.constant 6 : index
    %221 = vector.load %arg1[%c0_44, %c6] : memref<8x8xf32, #tpu.memory_space<vmem>>, vector<8x1xf32>
    %222 = vector.broadcast %221 : vector<8x1xf32> to vector<8x96xf32>
    %223 = vector.broadcast %0 : vector<1x96xf32> to vector<8x96xf32>
    %224 = arith.mulf %222, %223 : vector<8x96xf32>
    %225 = vector.broadcast %2 : vector<1x96xf32> to vector<8x96xf32>
    %226 = arith.addf %224, %225 : vector<8x96xf32>
    %cst_45 = arith.constant dense<0.000000e+00> : vector<8x96xf32>
    %227 = tpu.matmul %219, %1, %cst_45 {dimension_numbers = #tpu.dot_dimension_numbers<[1], [0], [0], [1], [0, 0, 1, 1], [], []>} : vector<8x32xf32>, vector<32x96xf32>, vector<8x96xf32> -> vector<8x96xf32>
    %228 = vector.broadcast %3 : vector<1x96xf32> to vector<8x96xf32>
    %229 = arith.addf %227, %228 : vector<8x96xf32>
    %230 = vector.extract_strided_slice %226 {offsets = [0, 0], sizes = [8, 32], strides = [1, 1]} : vector<8x96xf32> to vector<8x32xf32>
    %231 = vector.extract_strided_slice %229 {offsets = [0, 0], sizes = [8, 32], strides = [1, 1]} : vector<8x96xf32> to vector<8x32xf32>
    %232 = arith.addf %230, %231 : vector<8x32xf32>
    %233 = arith.negf %232 : vector<8x32xf32>
    %234 = math.exp %233 : vector<8x32xf32>
    %cst_46 = arith.constant 1.000000e+00 : f32
    %235 = vector.broadcast %cst_46 : f32 to vector<8x32xf32>
    %236 = arith.addf %235, %234 : vector<8x32xf32>
    %237 = arith.divf %235, %236 : vector<8x32xf32>
    %238 = vector.extract_strided_slice %226 {offsets = [0, 32], sizes = [8, 32], strides = [1, 1]} : vector<8x96xf32> to vector<8x32xf32>
    %239 = vector.extract_strided_slice %229 {offsets = [0, 32], sizes = [8, 32], strides = [1, 1]} : vector<8x96xf32> to vector<8x32xf32>
    %240 = arith.addf %238, %239 : vector<8x32xf32>
    %241 = arith.negf %240 : vector<8x32xf32>
    %242 = math.exp %241 : vector<8x32xf32>
    %cst_47 = arith.constant 1.000000e+00 : f32
    %243 = vector.broadcast %cst_47 : f32 to vector<8x32xf32>
    %244 = arith.addf %243, %242 : vector<8x32xf32>
    %245 = arith.divf %243, %244 : vector<8x32xf32>
    %246 = vector.extract_strided_slice %226 {offsets = [0, 64], sizes = [8, 32], strides = [1, 1]} : vector<8x96xf32> to vector<8x32xf32>
    %247 = vector.extract_strided_slice %229 {offsets = [0, 64], sizes = [8, 32], strides = [1, 1]} : vector<8x96xf32> to vector<8x32xf32>
    %248 = arith.mulf %237, %247 : vector<8x32xf32>
    %249 = arith.addf %246, %248 : vector<8x32xf32>
    %250 = math.tanh %249 : vector<8x32xf32>
    %cst_48 = arith.constant 1.000000e+00 : f32
    %251 = vector.broadcast %cst_48 : f32 to vector<8x32xf32>
    %252 = arith.subf %251, %245 : vector<8x32xf32>
    %253 = arith.mulf %252, %250 : vector<8x32xf32>
    %254 = arith.mulf %245, %219 : vector<8x32xf32>
    %255 = arith.addf %253, %254 : vector<8x32xf32>
    %c48_49 = arith.constant 48 : index
    %c0_50 = arith.constant 0 : index
    %256 = vector.load %arg5[%c48_49, %c0_50] : memref<64x32xf32, #tpu.memory_space<vmem>>, vector<8x32xf32>
    tpu.vector_store %arg5[%c48_49, %c0_50], %255 {strides = array<i32>} : memref<64x32xf32, #tpu.memory_space<vmem>>, vector<8x32xf32>,
    %c0_51 = arith.constant 0 : index
    %c7 = arith.constant 7 : index
    %257 = vector.load %arg1[%c0_51, %c7] : memref<8x8xf32, #tpu.memory_space<vmem>>, vector<8x1xf32>
    %258 = vector.broadcast %257 : vector<8x1xf32> to vector<8x96xf32>
    %259 = vector.broadcast %0 : vector<1x96xf32> to vector<8x96xf32>
    %260 = arith.mulf %258, %259 : vector<8x96xf32>
    %261 = vector.broadcast %2 : vector<1x96xf32> to vector<8x96xf32>
    %262 = arith.addf %260, %261 : vector<8x96xf32>
    %cst_52 = arith.constant dense<0.000000e+00> : vector<8x96xf32>
    %263 = tpu.matmul %255, %1, %cst_52 {dimension_numbers = #tpu.dot_dimension_numbers<[1], [0], [0], [1], [0, 0, 1, 1], [], []>} : vector<8x32xf32>, vector<32x96xf32>, vector<8x96xf32> -> vector<8x96xf32>
    %264 = vector.broadcast %3 : vector<1x96xf32> to vector<8x96xf32>
    %265 = arith.addf %263, %264 : vector<8x96xf32>
    %266 = vector.extract_strided_slice %262 {offsets = [0, 0], sizes = [8, 32], strides = [1, 1]} : vector<8x96xf32> to vector<8x32xf32>
    %267 = vector.extract_strided_slice %265 {offsets = [0, 0], sizes = [8, 32], strides = [1, 1]} : vector<8x96xf32> to vector<8x32xf32>
    %268 = arith.addf %266, %267 : vector<8x32xf32>
    %269 = arith.negf %268 : vector<8x32xf32>
    %270 = math.exp %269 : vector<8x32xf32>
    %cst_53 = arith.constant 1.000000e+00 : f32
    %271 = vector.broadcast %cst_53 : f32 to vector<8x32xf32>
    %272 = arith.addf %271, %270 : vector<8x32xf32>
    %273 = arith.divf %271, %272 : vector<8x32xf32>
    %274 = vector.extract_strided_slice %262 {offsets = [0, 32], sizes = [8, 32], strides = [1, 1]} : vector<8x96xf32> to vector<8x32xf32>
    %275 = vector.extract_strided_slice %265 {offsets = [0, 32], sizes = [8, 32], strides = [1, 1]} : vector<8x96xf32> to vector<8x32xf32>
    %276 = arith.addf %274, %275 : vector<8x32xf32>
    %277 = arith.negf %276 : vector<8x32xf32>
    %278 = math.exp %277 : vector<8x32xf32>
    %cst_54 = arith.constant 1.000000e+00 : f32
    %279 = vector.broadcast %cst_54 : f32 to vector<8x32xf32>
    %280 = arith.addf %279, %278 : vector<8x32xf32>
    %281 = arith.divf %279, %280 : vector<8x32xf32>
    %282 = vector.extract_strided_slice %262 {offsets = [0, 64], sizes = [8, 32], strides = [1, 1]} : vector<8x96xf32> to vector<8x32xf32>
    %283 = vector.extract_strided_slice %265 {offsets = [0, 64], sizes = [8, 32], strides = [1, 1]} : vector<8x96xf32> to vector<8x32xf32>
    %284 = arith.mulf %273, %283 : vector<8x32xf32>
    %285 = arith.addf %282, %284 : vector<8x32xf32>
    %286 = math.tanh %285 : vector<8x32xf32>
    %cst_55 = arith.constant 1.000000e+00 : f32
    %287 = vector.broadcast %cst_55 : f32 to vector<8x32xf32>
    %288 = arith.subf %287, %281 : vector<8x32xf32>
    %289 = arith.mulf %288, %286 : vector<8x32xf32>
    %290 = arith.mulf %281, %255 : vector<8x32xf32>
    %291 = arith.addf %289, %290 : vector<8x32xf32>
    %c56 = arith.constant 56 : index
    %c0_56 = arith.constant 0 : index
    %292 = vector.load %arg5[%c56, %c0_56] : memref<64x32xf32, #tpu.memory_space<vmem>>, vector<8x32xf32>
    tpu.vector_store %arg5[%c56, %c0_56], %291 {strides = array<i32>} : memref<64x32xf32, #tpu.memory_space<vmem>>, vector<8x32xf32>,
    %c56_57 = arith.constant 56 : index
    %c0_58 = arith.constant 0 : index
    %293 = vector.load %arg3[%c56_57, %c0_58] : memref<512x128xf32, #tpu.memory_space<vmem>>, vector<32x96xf32>
    %c88 = arith.constant 88 : index
    %c0_59 = arith.constant 0 : index
    %294 = vector.load %arg3[%c88, %c0_59] : memref<512x128xf32, #tpu.memory_space<vmem>>, vector<32x96xf32>
    %c120 = arith.constant 120 : index
    %c0_60 = arith.constant 0 : index
    %295 = vector.load %arg3[%c120, %c0_60] : memref<512x128xf32, #tpu.memory_space<vmem>>, vector<1x96xf32>
    %c128 = arith.constant 128 : index
    %c0_61 = arith.constant 0 : index
    %296 = vector.load %arg3[%c128, %c0_61] : memref<512x128xf32, #tpu.memory_space<vmem>>, vector<1x96xf32>
    %c0_62 = arith.constant 0 : index
    %c0_63 = arith.constant 0 : index
    %297 = vector.load %arg5[%c0_62, %c0_63] : memref<64x32xf32, #tpu.memory_space<vmem>>, vector<64x32xf32>
    %cst_64 = arith.constant dense<0.000000e+00> : vector<64x96xf32>
    %298 = tpu.matmul %297, %293, %cst_64 {dimension_numbers = #tpu.dot_dimension_numbers<[1], [0], [0], [1], [0, 0, 1, 1], [], []>} : vector<64x32xf32>, vector<32x96xf32>, vector<64x96xf32> -> vector<64x96xf32>
    %299 = vector.broadcast %295 : vector<1x96xf32> to vector<64x96xf32>
    %300 = arith.addf %298, %299 : vector<64x96xf32>
    %cst_65 = arith.constant 0.000000e+00 : f32
    %301 = vector.broadcast %cst_65 : f32 to vector<8x32xf32>
    %302 = vector.extract_strided_slice %300 {offsets = [0, 0], sizes = [8, 96], strides = [1, 1]} : vector<64x96xf32> to vector<8x96xf32>
    %cst_66 = arith.constant dense<0.000000e+00> : vector<8x96xf32>
    %303 = tpu.matmul %301, %294, %cst_66 {dimension_numbers = #tpu.dot_dimension_numbers<[1], [0], [0], [1], [0, 0, 1, 1], [], []>} : vector<8x32xf32>, vector<32x96xf32>, vector<8x96xf32> -> vector<8x96xf32>
    %304 = vector.broadcast %296 : vector<1x96xf32> to vector<8x96xf32>
    %305 = arith.addf %303, %304 : vector<8x96xf32>
    %306 = vector.extract_strided_slice %302 {offsets = [0, 0], sizes = [8, 32], strides = [1, 1]} : vector<8x96xf32> to vector<8x32xf32>
    %307 = vector.extract_strided_slice %305 {offsets = [0, 0], sizes = [8, 32], strides = [1, 1]} : vector<8x96xf32> to vector<8x32xf32>
    %308 = arith.addf %306, %307 : vector<8x32xf32>
    %309 = arith.negf %308 : vector<8x32xf32>
    %310 = math.exp %309 : vector<8x32xf32>
    %cst_67 = arith.constant 1.000000e+00 : f32
    %311 = vector.broadcast %cst_67 : f32 to vector<8x32xf32>
    %312 = arith.addf %311, %310 : vector<8x32xf32>
    %313 = arith.divf %311, %312 : vector<8x32xf32>
    %314 = vector.extract_strided_slice %302 {offsets = [0, 32], sizes = [8, 32], strides = [1, 1]} : vector<8x96xf32> to vector<8x32xf32>
    %315 = vector.extract_strided_slice %305 {offsets = [0, 32], sizes = [8, 32], strides = [1, 1]} : vector<8x96xf32> to vector<8x32xf32>
    %316 = arith.addf %314, %315 : vector<8x32xf32>
    %317 = arith.negf %316 : vector<8x32xf32>
    %318 = math.exp %317 : vector<8x32xf32>
    %cst_68 = arith.constant 1.000000e+00 : f32
    %319 = vector.broadcast %cst_68 : f32 to vector<8x32xf32>
    %320 = arith.addf %319, %318 : vector<8x32xf32>
    %321 = arith.divf %319, %320 : vector<8x32xf32>
    %322 = vector.extract_strided_slice %302 {offsets = [0, 64], sizes = [8, 32], strides = [1, 1]} : vector<8x96xf32> to vector<8x32xf32>
    %323 = vector.extract_strided_slice %305 {offsets = [0, 64], sizes = [8, 32], strides = [1, 1]} : vector<8x96xf32> to vector<8x32xf32>
    %324 = arith.mulf %313, %323 : vector<8x32xf32>
    %325 = arith.addf %322, %324 : vector<8x32xf32>
    %326 = math.tanh %325 : vector<8x32xf32>
    %cst_69 = arith.constant 1.000000e+00 : f32
    %327 = vector.broadcast %cst_69 : f32 to vector<8x32xf32>
    %328 = arith.subf %327, %321 : vector<8x32xf32>
    %329 = arith.mulf %328, %326 : vector<8x32xf32>
    %330 = arith.mulf %321, %301 : vector<8x32xf32>
    %331 = arith.addf %329, %330 : vector<8x32xf32>
    %332 = vector.extract_strided_slice %300 {offsets = [8, 0], sizes = [8, 96], strides = [1, 1]} : vector<64x96xf32> to vector<8x96xf32>
    %cst_70 = arith.constant dense<0.000000e+00> : vector<8x96xf32>
    %333 = tpu.matmul %331, %294, %cst_70 {dimension_numbers = #tpu.dot_dimension_numbers<[1], [0], [0], [1], [0, 0, 1, 1], [], []>} : vector<8x32xf32>, vector<32x96xf32>, vector<8x96xf32> -> vector<8x96xf32>
    %334 = vector.broadcast %296 : vector<1x96xf32> to vector<8x96xf32>
    %335 = arith.addf %333, %334 : vector<8x96xf32>
    %336 = vector.extract_strided_slice %332 {offsets = [0, 0], sizes = [8, 32], strides = [1, 1]} : vector<8x96xf32> to vector<8x32xf32>
    %337 = vector.extract_strided_slice %335 {offsets = [0, 0], sizes = [8, 32], strides = [1, 1]} : vector<8x96xf32> to vector<8x32xf32>
    %338 = arith.addf %336, %337 : vector<8x32xf32>
    %339 = arith.negf %338 : vector<8x32xf32>
    %340 = math.exp %339 : vector<8x32xf32>
    %cst_71 = arith.constant 1.000000e+00 : f32
    %341 = vector.broadcast %cst_71 : f32 to vector<8x32xf32>
    %342 = arith.addf %341, %340 : vector<8x32xf32>
    %343 = arith.divf %341, %342 : vector<8x32xf32>
    %344 = vector.extract_strided_slice %332 {offsets = [0, 32], sizes = [8, 32], strides = [1, 1]} : vector<8x96xf32> to vector<8x32xf32>
    %345 = vector.extract_strided_slice %335 {offsets = [0, 32], sizes = [8, 32], strides = [1, 1]} : vector<8x96xf32> to vector<8x32xf32>
    %346 = arith.addf %344, %345 : vector<8x32xf32>
    %347 = arith.negf %346 : vector<8x32xf32>
    %348 = math.exp %347 : vector<8x32xf32>
    %cst_72 = arith.constant 1.000000e+00 : f32
    %349 = vector.broadcast %cst_72 : f32 to vector<8x32xf32>
    %350 = arith.addf %349, %348 : vector<8x32xf32>
    %351 = arith.divf %349, %350 : vector<8x32xf32>
    %352 = vector.extract_strided_slice %332 {offsets = [0, 64], sizes = [8, 32], strides = [1, 1]} : vector<8x96xf32> to vector<8x32xf32>
    %353 = vector.extract_strided_slice %335 {offsets = [0, 64], sizes = [8, 32], strides = [1, 1]} : vector<8x96xf32> to vector<8x32xf32>
    %354 = arith.mulf %343, %353 : vector<8x32xf32>
    %355 = arith.addf %352, %354 : vector<8x32xf32>
    %356 = math.tanh %355 : vector<8x32xf32>
    %cst_73 = arith.constant 1.000000e+00 : f32
    %357 = vector.broadcast %cst_73 : f32 to vector<8x32xf32>
    %358 = arith.subf %357, %351 : vector<8x32xf32>
    %359 = arith.mulf %358, %356 : vector<8x32xf32>
    %360 = arith.mulf %351, %331 : vector<8x32xf32>
    %361 = arith.addf %359, %360 : vector<8x32xf32>
    %362 = vector.extract_strided_slice %300 {offsets = [16, 0], sizes = [8, 96], strides = [1, 1]} : vector<64x96xf32> to vector<8x96xf32>
    %cst_74 = arith.constant dense<0.000000e+00> : vector<8x96xf32>
    %363 = tpu.matmul %361, %294, %cst_74 {dimension_numbers = #tpu.dot_dimension_numbers<[1], [0], [0], [1], [0, 0, 1, 1], [], []>} : vector<8x32xf32>, vector<32x96xf32>, vector<8x96xf32> -> vector<8x96xf32>
    %364 = vector.broadcast %296 : vector<1x96xf32> to vector<8x96xf32>
    %365 = arith.addf %363, %364 : vector<8x96xf32>
    %366 = vector.extract_strided_slice %362 {offsets = [0, 0], sizes = [8, 32], strides = [1, 1]} : vector<8x96xf32> to vector<8x32xf32>
    %367 = vector.extract_strided_slice %365 {offsets = [0, 0], sizes = [8, 32], strides = [1, 1]} : vector<8x96xf32> to vector<8x32xf32>
    %368 = arith.addf %366, %367 : vector<8x32xf32>
    %369 = arith.negf %368 : vector<8x32xf32>
    %370 = math.exp %369 : vector<8x32xf32>
    %cst_75 = arith.constant 1.000000e+00 : f32
    %371 = vector.broadcast %cst_75 : f32 to vector<8x32xf32>
    %372 = arith.addf %371, %370 : vector<8x32xf32>
    %373 = arith.divf %371, %372 : vector<8x32xf32>
    %374 = vector.extract_strided_slice %362 {offsets = [0, 32], sizes = [8, 32], strides = [1, 1]} : vector<8x96xf32> to vector<8x32xf32>
    %375 = vector.extract_strided_slice %365 {offsets = [0, 32], sizes = [8, 32], strides = [1, 1]} : vector<8x96xf32> to vector<8x32xf32>
    %376 = arith.addf %374, %375 : vector<8x32xf32>
    %377 = arith.negf %376 : vector<8x32xf32>
    %378 = math.exp %377 : vector<8x32xf32>
    %cst_76 = arith.constant 1.000000e+00 : f32
    %379 = vector.broadcast %cst_76 : f32 to vector<8x32xf32>
    %380 = arith.addf %379, %378 : vector<8x32xf32>
    %381 = arith.divf %379, %380 : vector<8x32xf32>
    %382 = vector.extract_strided_slice %362 {offsets = [0, 64], sizes = [8, 32], strides = [1, 1]} : vector<8x96xf32> to vector<8x32xf32>
    %383 = vector.extract_strided_slice %365 {offsets = [0, 64], sizes = [8, 32], strides = [1, 1]} : vector<8x96xf32> to vector<8x32xf32>
    %384 = arith.mulf %373, %383 : vector<8x32xf32>
    %385 = arith.addf %382, %384 : vector<8x32xf32>
    %386 = math.tanh %385 : vector<8x32xf32>
    %cst_77 = arith.constant 1.000000e+00 : f32
    %387 = vector.broadcast %cst_77 : f32 to vector<8x32xf32>
    %388 = arith.subf %387, %381 : vector<8x32xf32>
    %389 = arith.mulf %388, %386 : vector<8x32xf32>
    %390 = arith.mulf %381, %361 : vector<8x32xf32>
    %391 = arith.addf %389, %390 : vector<8x32xf32>
    %392 = vector.extract_strided_slice %300 {offsets = [24, 0], sizes = [8, 96], strides = [1, 1]} : vector<64x96xf32> to vector<8x96xf32>
    %cst_78 = arith.constant dense<0.000000e+00> : vector<8x96xf32>
    %393 = tpu.matmul %391, %294, %cst_78 {dimension_numbers = #tpu.dot_dimension_numbers<[1], [0], [0], [1], [0, 0, 1, 1], [], []>} : vector<8x32xf32>, vector<32x96xf32>, vector<8x96xf32> -> vector<8x96xf32>
    %394 = vector.broadcast %296 : vector<1x96xf32> to vector<8x96xf32>
    %395 = arith.addf %393, %394 : vector<8x96xf32>
    %396 = vector.extract_strided_slice %392 {offsets = [0, 0], sizes = [8, 32], strides = [1, 1]} : vector<8x96xf32> to vector<8x32xf32>
    %397 = vector.extract_strided_slice %395 {offsets = [0, 0], sizes = [8, 32], strides = [1, 1]} : vector<8x96xf32> to vector<8x32xf32>
    %398 = arith.addf %396, %397 : vector<8x32xf32>
    %399 = arith.negf %398 : vector<8x32xf32>
    %400 = math.exp %399 : vector<8x32xf32>
    %cst_79 = arith.constant 1.000000e+00 : f32
    %401 = vector.broadcast %cst_79 : f32 to vector<8x32xf32>
    %402 = arith.addf %401, %400 : vector<8x32xf32>
    %403 = arith.divf %401, %402 : vector<8x32xf32>
    %404 = vector.extract_strided_slice %392 {offsets = [0, 32], sizes = [8, 32], strides = [1, 1]} : vector<8x96xf32> to vector<8x32xf32>
    %405 = vector.extract_strided_slice %395 {offsets = [0, 32], sizes = [8, 32], strides = [1, 1]} : vector<8x96xf32> to vector<8x32xf32>
    %406 = arith.addf %404, %405 : vector<8x32xf32>
    %407 = arith.negf %406 : vector<8x32xf32>
    %408 = math.exp %407 : vector<8x32xf32>
    %cst_80 = arith.constant 1.000000e+00 : f32
    %409 = vector.broadcast %cst_80 : f32 to vector<8x32xf32>
    %410 = arith.addf %409, %408 : vector<8x32xf32>
    %411 = arith.divf %409, %410 : vector<8x32xf32>
    %412 = vector.extract_strided_slice %392 {offsets = [0, 64], sizes = [8, 32], strides = [1, 1]} : vector<8x96xf32> to vector<8x32xf32>
    %413 = vector.extract_strided_slice %395 {offsets = [0, 64], sizes = [8, 32], strides = [1, 1]} : vector<8x96xf32> to vector<8x32xf32>
    %414 = arith.mulf %403, %413 : vector<8x32xf32>
    %415 = arith.addf %412, %414 : vector<8x32xf32>
    %416 = math.tanh %415 : vector<8x32xf32>
    %cst_81 = arith.constant 1.000000e+00 : f32
    %417 = vector.broadcast %cst_81 : f32 to vector<8x32xf32>
    %418 = arith.subf %417, %411 : vector<8x32xf32>
    %419 = arith.mulf %418, %416 : vector<8x32xf32>
    %420 = arith.mulf %411, %391 : vector<8x32xf32>
    %421 = arith.addf %419, %420 : vector<8x32xf32>
    %422 = vector.extract_strided_slice %300 {offsets = [32, 0], sizes = [8, 96], strides = [1, 1]} : vector<64x96xf32> to vector<8x96xf32>
    %cst_82 = arith.constant dense<0.000000e+00> : vector<8x96xf32>
    %423 = tpu.matmul %421, %294, %cst_82 {dimension_numbers = #tpu.dot_dimension_numbers<[1], [0], [0], [1], [0, 0, 1, 1], [], []>} : vector<8x32xf32>, vector<32x96xf32>, vector<8x96xf32> -> vector<8x96xf32>
    %424 = vector.broadcast %296 : vector<1x96xf32> to vector<8x96xf32>
    %425 = arith.addf %423, %424 : vector<8x96xf32>
    %426 = vector.extract_strided_slice %422 {offsets = [0, 0], sizes = [8, 32], strides = [1, 1]} : vector<8x96xf32> to vector<8x32xf32>
    %427 = vector.extract_strided_slice %425 {offsets = [0, 0], sizes = [8, 32], strides = [1, 1]} : vector<8x96xf32> to vector<8x32xf32>
    %428 = arith.addf %426, %427 : vector<8x32xf32>
    %429 = arith.negf %428 : vector<8x32xf32>
    %430 = math.exp %429 : vector<8x32xf32>
    %cst_83 = arith.constant 1.000000e+00 : f32
    %431 = vector.broadcast %cst_83 : f32 to vector<8x32xf32>
    %432 = arith.addf %431, %430 : vector<8x32xf32>
    %433 = arith.divf %431, %432 : vector<8x32xf32>
    %434 = vector.extract_strided_slice %422 {offsets = [0, 32], sizes = [8, 32], strides = [1, 1]} : vector<8x96xf32> to vector<8x32xf32>
    %435 = vector.extract_strided_slice %425 {offsets = [0, 32], sizes = [8, 32], strides = [1, 1]} : vector<8x96xf32> to vector<8x32xf32>
    %436 = arith.addf %434, %435 : vector<8x32xf32>
    %437 = arith.negf %436 : vector<8x32xf32>
    %438 = math.exp %437 : vector<8x32xf32>
    %cst_84 = arith.constant 1.000000e+00 : f32
    %439 = vector.broadcast %cst_84 : f32 to vector<8x32xf32>
    %440 = arith.addf %439, %438 : vector<8x32xf32>
    %441 = arith.divf %439, %440 : vector<8x32xf32>
    %442 = vector.extract_strided_slice %422 {offsets = [0, 64], sizes = [8, 32], strides = [1, 1]} : vector<8x96xf32> to vector<8x32xf32>
    %443 = vector.extract_strided_slice %425 {offsets = [0, 64], sizes = [8, 32], strides = [1, 1]} : vector<8x96xf32> to vector<8x32xf32>
    %444 = arith.mulf %433, %443 : vector<8x32xf32>
    %445 = arith.addf %442, %444 : vector<8x32xf32>
    %446 = math.tanh %445 : vector<8x32xf32>
    %cst_85 = arith.constant 1.000000e+00 : f32
    %447 = vector.broadcast %cst_85 : f32 to vector<8x32xf32>
    %448 = arith.subf %447, %441 : vector<8x32xf32>
    %449 = arith.mulf %448, %446 : vector<8x32xf32>
    %450 = arith.mulf %441, %421 : vector<8x32xf32>
    %451 = arith.addf %449, %450 : vector<8x32xf32>
    %452 = vector.extract_strided_slice %300 {offsets = [40, 0], sizes = [8, 96], strides = [1, 1]} : vector<64x96xf32> to vector<8x96xf32>
    %cst_86 = arith.constant dense<0.000000e+00> : vector<8x96xf32>
    %453 = tpu.matmul %451, %294, %cst_86 {dimension_numbers = #tpu.dot_dimension_numbers<[1], [0], [0], [1], [0, 0, 1, 1], [], []>} : vector<8x32xf32>, vector<32x96xf32>, vector<8x96xf32> -> vector<8x96xf32>
    %454 = vector.broadcast %296 : vector<1x96xf32> to vector<8x96xf32>
    %455 = arith.addf %453, %454 : vector<8x96xf32>
    %456 = vector.extract_strided_slice %452 {offsets = [0, 0], sizes = [8, 32], strides = [1, 1]} : vector<8x96xf32> to vector<8x32xf32>
    %457 = vector.extract_strided_slice %455 {offsets = [0, 0], sizes = [8, 32], strides = [1, 1]} : vector<8x96xf32> to vector<8x32xf32>
    %458 = arith.addf %456, %457 : vector<8x32xf32>
    %459 = arith.negf %458 : vector<8x32xf32>
    %460 = math.exp %459 : vector<8x32xf32>
    %cst_87 = arith.constant 1.000000e+00 : f32
    %461 = vector.broadcast %cst_87 : f32 to vector<8x32xf32>
    %462 = arith.addf %461, %460 : vector<8x32xf32>
    %463 = arith.divf %461, %462 : vector<8x32xf32>
    %464 = vector.extract_strided_slice %452 {offsets = [0, 32], sizes = [8, 32], strides = [1, 1]} : vector<8x96xf32> to vector<8x32xf32>
    %465 = vector.extract_strided_slice %455 {offsets = [0, 32], sizes = [8, 32], strides = [1, 1]} : vector<8x96xf32> to vector<8x32xf32>
    %466 = arith.addf %464, %465 : vector<8x32xf32>
    %467 = arith.negf %466 : vector<8x32xf32>
    %468 = math.exp %467 : vector<8x32xf32>
    %cst_88 = arith.constant 1.000000e+00 : f32
    %469 = vector.broadcast %cst_88 : f32 to vector<8x32xf32>
    %470 = arith.addf %469, %468 : vector<8x32xf32>
    %471 = arith.divf %469, %470 : vector<8x32xf32>
    %472 = vector.extract_strided_slice %452 {offsets = [0, 64], sizes = [8, 32], strides = [1, 1]} : vector<8x96xf32> to vector<8x32xf32>
    %473 = vector.extract_strided_slice %455 {offsets = [0, 64], sizes = [8, 32], strides = [1, 1]} : vector<8x96xf32> to vector<8x32xf32>
    %474 = arith.mulf %463, %473 : vector<8x32xf32>
    %475 = arith.addf %472, %474 : vector<8x32xf32>
    %476 = math.tanh %475 : vector<8x32xf32>
    %cst_89 = arith.constant 1.000000e+00 : f32
    %477 = vector.broadcast %cst_89 : f32 to vector<8x32xf32>
    %478 = arith.subf %477, %471 : vector<8x32xf32>
    %479 = arith.mulf %478, %476 : vector<8x32xf32>
    %480 = arith.mulf %471, %451 : vector<8x32xf32>
    %481 = arith.addf %479, %480 : vector<8x32xf32>
    %482 = vector.extract_strided_slice %300 {offsets = [48, 0], sizes = [8, 96], strides = [1, 1]} : vector<64x96xf32> to vector<8x96xf32>
    %cst_90 = arith.constant dense<0.000000e+00> : vector<8x96xf32>
    %483 = tpu.matmul %481, %294, %cst_90 {dimension_numbers = #tpu.dot_dimension_numbers<[1], [0], [0], [1], [0, 0, 1, 1], [], []>} : vector<8x32xf32>, vector<32x96xf32>, vector<8x96xf32> -> vector<8x96xf32>
    %484 = vector.broadcast %296 : vector<1x96xf32> to vector<8x96xf32>
    %485 = arith.addf %483, %484 : vector<8x96xf32>
    %486 = vector.extract_strided_slice %482 {offsets = [0, 0], sizes = [8, 32], strides = [1, 1]} : vector<8x96xf32> to vector<8x32xf32>
    %487 = vector.extract_strided_slice %485 {offsets = [0, 0], sizes = [8, 32], strides = [1, 1]} : vector<8x96xf32> to vector<8x32xf32>
    %488 = arith.addf %486, %487 : vector<8x32xf32>
    %489 = arith.negf %488 : vector<8x32xf32>
    %490 = math.exp %489 : vector<8x32xf32>
    %cst_91 = arith.constant 1.000000e+00 : f32
    %491 = vector.broadcast %cst_91 : f32 to vector<8x32xf32>
    %492 = arith.addf %491, %490 : vector<8x32xf32>
    %493 = arith.divf %491, %492 : vector<8x32xf32>
    %494 = vector.extract_strided_slice %482 {offsets = [0, 32], sizes = [8, 32], strides = [1, 1]} : vector<8x96xf32> to vector<8x32xf32>
    %495 = vector.extract_strided_slice %485 {offsets = [0, 32], sizes = [8, 32], strides = [1, 1]} : vector<8x96xf32> to vector<8x32xf32>
    %496 = arith.addf %494, %495 : vector<8x32xf32>
    %497 = arith.negf %496 : vector<8x32xf32>
    %498 = math.exp %497 : vector<8x32xf32>
    %cst_92 = arith.constant 1.000000e+00 : f32
    %499 = vector.broadcast %cst_92 : f32 to vector<8x32xf32>
    %500 = arith.addf %499, %498 : vector<8x32xf32>
    %501 = arith.divf %499, %500 : vector<8x32xf32>
    %502 = vector.extract_strided_slice %482 {offsets = [0, 64], sizes = [8, 32], strides = [1, 1]} : vector<8x96xf32> to vector<8x32xf32>
    %503 = vector.extract_strided_slice %485 {offsets = [0, 64], sizes = [8, 32], strides = [1, 1]} : vector<8x96xf32> to vector<8x32xf32>
    %504 = arith.mulf %493, %503 : vector<8x32xf32>
    %505 = arith.addf %502, %504 : vector<8x32xf32>
    %506 = math.tanh %505 : vector<8x32xf32>
    %cst_93 = arith.constant 1.000000e+00 : f32
    %507 = vector.broadcast %cst_93 : f32 to vector<8x32xf32>
    %508 = arith.subf %507, %501 : vector<8x32xf32>
    %509 = arith.mulf %508, %506 : vector<8x32xf32>
    %510 = arith.mulf %501, %481 : vector<8x32xf32>
    %511 = arith.addf %509, %510 : vector<8x32xf32>
    %512 = vector.extract_strided_slice %300 {offsets = [56, 0], sizes = [8, 96], strides = [1, 1]} : vector<64x96xf32> to vector<8x96xf32>
    %cst_94 = arith.constant dense<0.000000e+00> : vector<8x96xf32>
    %513 = tpu.matmul %511, %294, %cst_94 {dimension_numbers = #tpu.dot_dimension_numbers<[1], [0], [0], [1], [0, 0, 1, 1], [], []>} : vector<8x32xf32>, vector<32x96xf32>, vector<8x96xf32> -> vector<8x96xf32>
    %514 = vector.broadcast %296 : vector<1x96xf32> to vector<8x96xf32>
    %515 = arith.addf %513, %514 : vector<8x96xf32>
    %516 = vector.extract_strided_slice %512 {offsets = [0, 0], sizes = [8, 32], strides = [1, 1]} : vector<8x96xf32> to vector<8x32xf32>
    %517 = vector.extract_strided_slice %515 {offsets = [0, 0], sizes = [8, 32], strides = [1, 1]} : vector<8x96xf32> to vector<8x32xf32>
    %518 = arith.addf %516, %517 : vector<8x32xf32>
    %519 = arith.negf %518 : vector<8x32xf32>
    %520 = math.exp %519 : vector<8x32xf32>
    %cst_95 = arith.constant 1.000000e+00 : f32
    %521 = vector.broadcast %cst_95 : f32 to vector<8x32xf32>
    %522 = arith.addf %521, %520 : vector<8x32xf32>
    %523 = arith.divf %521, %522 : vector<8x32xf32>
    %524 = vector.extract_strided_slice %512 {offsets = [0, 32], sizes = [8, 32], strides = [1, 1]} : vector<8x96xf32> to vector<8x32xf32>
    %525 = vector.extract_strided_slice %515 {offsets = [0, 32], sizes = [8, 32], strides = [1, 1]} : vector<8x96xf32> to vector<8x32xf32>
    %526 = arith.addf %524, %525 : vector<8x32xf32>
    %527 = arith.negf %526 : vector<8x32xf32>
    %528 = math.exp %527 : vector<8x32xf32>
    %cst_96 = arith.constant 1.000000e+00 : f32
    %529 = vector.broadcast %cst_96 : f32 to vector<8x32xf32>
    %530 = arith.addf %529, %528 : vector<8x32xf32>
    %531 = arith.divf %529, %530 : vector<8x32xf32>
    %532 = vector.extract_strided_slice %512 {offsets = [0, 64], sizes = [8, 32], strides = [1, 1]} : vector<8x96xf32> to vector<8x32xf32>
    %533 = vector.extract_strided_slice %515 {offsets = [0, 64], sizes = [8, 32], strides = [1, 1]} : vector<8x96xf32> to vector<8x32xf32>
    %534 = arith.mulf %523, %533 : vector<8x32xf32>
    %535 = arith.addf %532, %534 : vector<8x32xf32>
    %536 = math.tanh %535 : vector<8x32xf32>
    %cst_97 = arith.constant 1.000000e+00 : f32
    %537 = vector.broadcast %cst_97 : f32 to vector<8x32xf32>
    %538 = arith.subf %537, %531 : vector<8x32xf32>
    %539 = arith.mulf %538, %536 : vector<8x32xf32>
    %540 = arith.mulf %531, %511 : vector<8x32xf32>
    %541 = arith.addf %539, %540 : vector<8x32xf32>
    %c136 = arith.constant 136 : index
    %c0_98 = arith.constant 0 : index
    %542 = vector.load %arg3[%c136, %c0_98] : memref<512x128xf32, #tpu.memory_space<vmem>>, vector<32x32xf32>
    %cst_99 = arith.constant dense<0.000000e+00> : vector<8x32xf32>
    %543 = tpu.matmul %541, %542, %cst_99 {dimension_numbers = #tpu.dot_dimension_numbers<[1], [0], [0], [1], [0, 0, 1, 1], [], []>} : vector<8x32xf32>, vector<32x32xf32>, vector<8x32xf32> -> vector<8x32xf32>
    %c168 = arith.constant 168 : index
    %c0_100 = arith.constant 0 : index
    %544 = vector.load %arg3[%c168, %c0_100] : memref<512x128xf32, #tpu.memory_space<vmem>>, vector<1x32xf32>
    %545 = vector.broadcast %544 : vector<1x32xf32> to vector<8x32xf32>
    %546 = arith.addf %543, %545 : vector<8x32xf32>
    %c176 = arith.constant 176 : index
    %c0_101 = arith.constant 0 : index
    %547 = vector.load %arg3[%c176, %c0_101] : memref<512x128xf32, #tpu.memory_space<vmem>>, vector<1x32xf32>
    %c184 = arith.constant 184 : index
    %c0_102 = arith.constant 0 : index
    %548 = vector.load %arg3[%c184, %c0_102] : memref<512x128xf32, #tpu.memory_space<vmem>>, vector<1x32xf32>
    %cst_103 = arith.constant dense<0.000000e+00> : vector<8xf32>
    %549 = vector.multi_reduction <add>, %546, %cst_103 [1] : vector<8x32xf32> to vector<8xf32>
    %550 = vector.shape_cast %549 : vector<8xf32> to vector<8x1xf32>
    %cst_104 = arith.constant 3.200000e+01 : f32
    %551 = vector.broadcast %cst_104 : f32 to vector<8x1xf32>
    %552 = arith.divf %550, %551 : vector<8x1xf32>
    %553 = vector.broadcast %552 : vector<8x1xf32> to vector<8x32xf32>
    %554 = arith.subf %546, %553 : vector<8x32xf32>
    %555 = arith.mulf %554, %554 : vector<8x32xf32>
    %cst_105 = arith.constant dense<0.000000e+00> : vector<8xf32>
    %556 = vector.multi_reduction <add>, %555, %cst_105 [1] : vector<8x32xf32> to vector<8xf32>
    %557 = vector.shape_cast %556 : vector<8xf32> to vector<8x1xf32>
    %cst_106 = arith.constant 3.200000e+01 : f32
    %558 = vector.broadcast %cst_106 : f32 to vector<8x1xf32>
    %559 = arith.divf %557, %558 : vector<8x1xf32>
    %560 = vector.broadcast %552 : vector<8x1xf32> to vector<8x32xf32>
    %561 = arith.subf %546, %560 : vector<8x32xf32>
    %cst_107 = arith.constant 9.99999974E-6 : f32
    %562 = vector.broadcast %cst_107 : f32 to vector<8x1xf32>
    %563 = arith.addf %559, %562 : vector<8x1xf32>
    %564 = math.rsqrt %563 : vector<8x1xf32>
    %565 = vector.broadcast %564 : vector<8x1xf32> to vector<8x32xf32>
    %566 = arith.mulf %561, %565 : vector<8x32xf32>
    %567 = vector.broadcast %547 : vector<1x32xf32> to vector<8x32xf32>
    %568 = arith.mulf %566, %567 : vector<8x32xf32>
    %569 = vector.broadcast %548 : vector<1x32xf32> to vector<8x32xf32>
    %570 = arith.addf %568, %569 : vector<8x32xf32>
    %cst_108 = arith.constant 0.000000e+00 : f32
    %571 = vector.broadcast %cst_108 : f32 to vector<8x32xf32>
    %572 = arith.maximumf %570, %571 : vector<8x32xf32>
    %c192 = arith.constant 192 : index
    %c0_109 = arith.constant 0 : index
    %573 = vector.load %arg3[%c192, %c0_109] : memref<512x128xf32, #tpu.memory_space<vmem>>, vector<32x32xf32>
    %cst_110 = arith.constant dense<0.000000e+00> : vector<8x32xf32>
    %574 = tpu.matmul %572, %573, %cst_110 {dimension_numbers = #tpu.dot_dimension_numbers<[1], [0], [0], [1], [0, 0, 1, 1], [], []>} : vector<8x32xf32>, vector<32x32xf32>, vector<8x32xf32> -> vector<8x32xf32>
    %c224 = arith.constant 224 : index
    %c0_111 = arith.constant 0 : index
    %575 = vector.load %arg3[%c224, %c0_111] : memref<512x128xf32, #tpu.memory_space<vmem>>, vector<1x32xf32>
    %576 = vector.broadcast %575 : vector<1x32xf32> to vector<8x32xf32>
    %577 = arith.addf %574, %576 : vector<8x32xf32>
    %c232 = arith.constant 232 : index
    %c0_112 = arith.constant 0 : index
    %578 = vector.load %arg3[%c232, %c0_112] : memref<512x128xf32, #tpu.memory_space<vmem>>, vector<1x32xf32>
    %c240 = arith.constant 240 : index
    %c0_113 = arith.constant 0 : index
    %579 = vector.load %arg3[%c240, %c0_113] : memref<512x128xf32, #tpu.memory_space<vmem>>, vector<1x32xf32>
    %cst_114 = arith.constant dense<0.000000e+00> : vector<8xf32>
    %580 = vector.multi_reduction <add>, %577, %cst_114 [1] : vector<8x32xf32> to vector<8xf32>
    %581 = vector.shape_cast %580 : vector<8xf32> to vector<8x1xf32>
    %cst_115 = arith.constant 3.200000e+01 : f32
    %582 = vector.broadcast %cst_115 : f32 to vector<8x1xf32>
    %583 = arith.divf %581, %582 : vector<8x1xf32>
    %584 = vector.broadcast %583 : vector<8x1xf32> to vector<8x32xf32>
    %585 = arith.subf %577, %584 : vector<8x32xf32>
    %586 = arith.mulf %585, %585 : vector<8x32xf32>
    %cst_116 = arith.constant dense<0.000000e+00> : vector<8xf32>
    %587 = vector.multi_reduction <add>, %586, %cst_116 [1] : vector<8x32xf32> to vector<8xf32>
    %588 = vector.shape_cast %587 : vector<8xf32> to vector<8x1xf32>
    %cst_117 = arith.constant 3.200000e+01 : f32
    %589 = vector.broadcast %cst_117 : f32 to vector<8x1xf32>
    %590 = arith.divf %588, %589 : vector<8x1xf32>
    %591 = vector.broadcast %583 : vector<8x1xf32> to vector<8x32xf32>
    %592 = arith.subf %577, %591 : vector<8x32xf32>
    %cst_118 = arith.constant 9.99999974E-6 : f32
    %593 = vector.broadcast %cst_118 : f32 to vector<8x1xf32>
    %594 = arith.addf %590, %593 : vector<8x1xf32>
    %595 = math.rsqrt %594 : vector<8x1xf32>
    %596 = vector.broadcast %595 : vector<8x1xf32> to vector<8x32xf32>
    %597 = arith.mulf %592, %596 : vector<8x32xf32>
    %598 = vector.broadcast %578 : vector<1x32xf32> to vector<8x32xf32>
    %599 = arith.mulf %597, %598 : vector<8x32xf32>
    %600 = vector.broadcast %579 : vector<1x32xf32> to vector<8x32xf32>
    %601 = arith.addf %599, %600 : vector<8x32xf32>
    %cst_119 = arith.constant 0.000000e+00 : f32
    %602 = vector.broadcast %cst_119 : f32 to vector<8x32xf32>
    %603 = arith.maximumf %601, %602 : vector<8x32xf32>
    %c248 = arith.constant 248 : index
    %c0_120 = arith.constant 0 : index
    %604 = vector.load %arg3[%c248, %c0_120] : memref<512x128xf32, #tpu.memory_space<vmem>>, vector<32x8xf32>
    %cst_121 = arith.constant dense<0.000000e+00> : vector<8x8xf32>
    %605 = tpu.matmul %603, %604, %cst_121 {dimension_numbers = #tpu.dot_dimension_numbers<[1], [0], [0], [1], [0, 0, 1, 1], [], []>} : vector<8x32xf32>, vector<32x8xf32>, vector<8x8xf32> -> vector<8x8xf32>
    %c280 = arith.constant 280 : index
    %c0_122 = arith.constant 0 : index
    %606 = vector.load %arg3[%c280, %c0_122] : memref<512x128xf32, #tpu.memory_space<vmem>>, vector<1x8xf32>
    %607 = vector.broadcast %606 : vector<1x8xf32> to vector<8x8xf32>
    %608 = arith.addf %605, %607 : vector<8x8xf32>
    %c0_123 = arith.constant 0 : index
    %c0_124 = arith.constant 0 : index
    %609 = vector.load %arg2[%c0_123, %c0_124] : memref<8x128xf32, #tpu.memory_space<vmem>>, vector<8x128xf32>
    %610 = vector.extract_strided_slice %609 {offsets = [0, 0], sizes = [8, 8], strides = [1, 1]} : vector<8x128xf32> to vector<8x8xf32>
    %cst_125 = arith.constant 1.000000e-10 : f32
    %611 = vector.broadcast %cst_125 : f32 to vector<8x8xf32>
    %612 = arith.addf %610, %611 : vector<8x8xf32>
    %613 = math.log %612 : vector<8x8xf32>
    %cst_126 = arith.constant 0.000000e+00 : f32
    %614 = vector.broadcast %cst_126 : f32 to vector<8x8xf32>
    %615 = arith.subf %614, %613 : vector<8x8xf32>
    %cst_127 = arith.constant 1.000000e-10 : f32
    %616 = vector.broadcast %cst_127 : f32 to vector<8x8xf32>
    %617 = arith.addf %615, %616 : vector<8x8xf32>
    %618 = math.log %617 : vector<8x8xf32>
    %cst_128 = arith.constant 0.000000e+00 : f32
    %619 = vector.broadcast %cst_128 : f32 to vector<8x8xf32>
    %620 = arith.subf %619, %618 : vector<8x8xf32>
    %621 = arith.addf %608, %620 : vector<8x8xf32>
    %622 = tpu.iota {dimensions = array<i32: 1>} : vector<8x8xi32>
    %cst_129 = arith.constant dense<0xFF800000> : vector<8xf32>
    %623 = vector.multi_reduction <maximumf>, %621, %cst_129 [1] : vector<8x8xf32> to vector<8xf32>
    %624 = vector.shape_cast %623 : vector<8xf32> to vector<8x1xf32>
    %625 = vector.broadcast %624 : vector<8x1xf32> to vector<8x8xf32>
    %626 = arith.cmpf oeq, %621, %625 : vector<8x8xf32>
    %c8_i32 = arith.constant 8 : i32
    %627 = vector.broadcast %c8_i32 : i32 to vector<8x8xi32>
    %628 = arith.select %626, %622, %627 : vector<8x8xi1>, vector<8x8xi32>
    %cst_130 = arith.constant dense<2147483647> : vector<8xi32>
    %629 = vector.multi_reduction <minsi>, %628, %cst_130 [1] : vector<8x8xi32> to vector<8xi32>
    %630 = vector.shape_cast %629 : vector<8xi32> to vector<8x1xi32>
    %631 = vector.broadcast %630 : vector<8x1xi32> to vector<8x8xi32>
    %632 = arith.cmpi eq, %622, %631 : vector<8x8xi32>
    %633 = arith.extui %632 : vector<8x8xi1> to vector<8x8xi32>
    %634 = arith.sitofp %633 : vector<8x8xi32> to vector<8x8xf32>
    %c288 = arith.constant 288 : index
    %c0_131 = arith.constant 0 : index
    %635 = vector.load %arg3[%c288, %c0_131] : memref<512x128xf32, #tpu.memory_space<vmem>>, vector<32x64xf32>
    %cst_132 = arith.constant dense<0.000000e+00> : vector<8x64xf32>
    %636 = tpu.matmul %541, %635, %cst_132 {dimension_numbers = #tpu.dot_dimension_numbers<[1], [0], [0], [1], [0, 0, 1, 1], [], []>} : vector<8x32xf32>, vector<32x64xf32>, vector<8x64xf32> -> vector<8x64xf32>
    %c320 = arith.constant 320 : index
    %c0_133 = arith.constant 0 : index
    %637 = vector.load %arg3[%c320, %c0_133] : memref<512x128xf32, #tpu.memory_space<vmem>>, vector<8x64xf32>
    %cst_134 = arith.constant dense<0.000000e+00> : vector<8x64xf32>
    %638 = tpu.matmul %634, %637, %cst_134 {dimension_numbers = #tpu.dot_dimension_numbers<[1], [0], [0], [1], [0, 0, 1, 1], [], []>} : vector<8x8xf32>, vector<8x64xf32>, vector<8x64xf32> -> vector<8x64xf32>
    %639 = arith.addf %636, %638 : vector<8x64xf32>
    %c328 = arith.constant 328 : index
    %c0_135 = arith.constant 0 : index
    %640 = vector.load %arg3[%c328, %c0_135] : memref<512x128xf32, #tpu.memory_space<vmem>>, vector<1x64xf32>
    %641 = vector.broadcast %640 : vector<1x64xf32> to vector<8x64xf32>
    %642 = arith.addf %639, %641 : vector<8x64xf32>
    %c336 = arith.constant 336 : index
    %c0_136 = arith.constant 0 : index
    %643 = vector.load %arg3[%c336, %c0_136] : memref<512x128xf32, #tpu.memory_space<vmem>>, vector<1x64xf32>
    %c344 = arith.constant 344 : index
    %c0_137 = arith.constant 0 : index
    %644 = vector.load %arg3[%c344, %c0_137] : memref<512x128xf32, #tpu.memory_space<vmem>>, vector<1x64xf32>
    %645 = vector.extract_strided_slice %642 {offsets = [0, 0], sizes = [8, 32], strides = [1, 1]} : vector<8x64xf32> to vector<8x32xf32>
    %cst_138 = arith.constant dense<0.000000e+00> : vector<8xf32>
    %646 = vector.multi_reduction <add>, %645, %cst_138 [1] : vector<8x32xf32> to vector<8xf32>
    %647 = vector.shape_cast %646 : vector<8xf32> to vector<8x1xf32>
    %cst_139 = arith.constant 3.200000e+01 : f32
    %648 = vector.broadcast %cst_139 : f32 to vector<8x1xf32>
    %649 = arith.divf %647, %648 : vector<8x1xf32>
    %650 = vector.broadcast %649 : vector<8x1xf32> to vector<8x32xf32>
    %651 = arith.subf %645, %650 : vector<8x32xf32>
    %652 = arith.mulf %651, %651 : vector<8x32xf32>
    %cst_140 = arith.constant dense<0.000000e+00> : vector<8xf32>
    %653 = vector.multi_reduction <add>, %652, %cst_140 [1] : vector<8x32xf32> to vector<8xf32>
    %654 = vector.shape_cast %653 : vector<8xf32> to vector<8x1xf32>
    %cst_141 = arith.constant 3.200000e+01 : f32
    %655 = vector.broadcast %cst_141 : f32 to vector<8x1xf32>
    %656 = arith.divf %654, %655 : vector<8x1xf32>
    %657 = vector.broadcast %649 : vector<8x1xf32> to vector<8x32xf32>
    %658 = arith.subf %645, %657 : vector<8x32xf32>
    %cst_142 = arith.constant 9.99999974E-6 : f32
    %659 = vector.broadcast %cst_142 : f32 to vector<8x1xf32>
    %660 = arith.addf %656, %659 : vector<8x1xf32>
    %661 = math.rsqrt %660 : vector<8x1xf32>
    %662 = vector.broadcast %661 : vector<8x1xf32> to vector<8x32xf32>
    %663 = arith.mulf %658, %662 : vector<8x32xf32>
    %664 = vector.extract_strided_slice %642 {offsets = [0, 32], sizes = [8, 32], strides = [1, 1]} : vector<8x64xf32> to vector<8x32xf32>
    %cst_143 = arith.constant dense<0.000000e+00> : vector<8xf32>
    %665 = vector.multi_reduction <add>, %664, %cst_143 [1] : vector<8x32xf32> to vector<8xf32>
    %666 = vector.shape_cast %665 : vector<8xf32> to vector<8x1xf32>
    %cst_144 = arith.constant 3.200000e+01 : f32
    %667 = vector.broadcast %cst_144 : f32 to vector<8x1xf32>
    %668 = arith.divf %666, %667 : vector<8x1xf32>
    %669 = vector.broadcast %668 : vector<8x1xf32> to vector<8x32xf32>
    %670 = arith.subf %664, %669 : vector<8x32xf32>
    %671 = arith.mulf %670, %670 : vector<8x32xf32>
    %cst_145 = arith.constant dense<0.000000e+00> : vector<8xf32>
    %672 = vector.multi_reduction <add>, %671, %cst_145 [1] : vector<8x32xf32> to vector<8xf32>
    %673 = vector.shape_cast %672 : vector<8xf32> to vector<8x1xf32>
    %cst_146 = arith.constant 3.200000e+01 : f32
    %674 = vector.broadcast %cst_146 : f32 to vector<8x1xf32>
    %675 = arith.divf %673, %674 : vector<8x1xf32>
    %676 = vector.broadcast %668 : vector<8x1xf32> to vector<8x32xf32>
    %677 = arith.subf %664, %676 : vector<8x32xf32>
    %cst_147 = arith.constant 9.99999974E-6 : f32
    %678 = vector.broadcast %cst_147 : f32 to vector<8x1xf32>
    %679 = arith.addf %675, %678 : vector<8x1xf32>
    %680 = math.rsqrt %679 : vector<8x1xf32>
    %681 = vector.broadcast %680 : vector<8x1xf32> to vector<8x32xf32>
    %682 = arith.mulf %677, %681 : vector<8x32xf32>
    %683 = tpu.concatenate %663, %682 in 1 : vector<8x32xf32>, vector<8x32xf32> -> vector<8x64xf32>
    %684 = vector.broadcast %643 : vector<1x64xf32> to vector<8x64xf32>
    %685 = arith.mulf %683, %684 : vector<8x64xf32>
    %686 = vector.broadcast %644 : vector<1x64xf32> to vector<8x64xf32>
    %687 = arith.addf %685, %686 : vector<8x64xf32>
    %cst_148 = arith.constant 0.000000e+00 : f32
    %688 = vector.broadcast %cst_148 : f32 to vector<8x64xf32>
    %689 = arith.maximumf %687, %688 : vector<8x64xf32>
    %c352 = arith.constant 352 : index
    %c0_149 = arith.constant 0 : index
    %690 = vector.load %arg3[%c352, %c0_149] : memref<512x128xf32, #tpu.memory_space<vmem>>, vector<64x64xf32>
    %cst_150 = arith.constant dense<0.000000e+00> : vector<8x64xf32>
    %691 = tpu.matmul %689, %690, %cst_150 {dimension_numbers = #tpu.dot_dimension_numbers<[1], [0], [0], [1], [0, 0, 1, 1], [], []>} : vector<8x64xf32>, vector<64x64xf32>, vector<8x64xf32> -> vector<8x64xf32>
    %c416 = arith.constant 416 : index
    %c0_151 = arith.constant 0 : index
    %692 = vector.load %arg3[%c416, %c0_151] : memref<512x128xf32, #tpu.memory_space<vmem>>, vector<1x64xf32>
    %693 = vector.broadcast %692 : vector<1x64xf32> to vector<8x64xf32>
    %694 = arith.addf %691, %693 : vector<8x64xf32>
    %c424 = arith.constant 424 : index
    %c0_152 = arith.constant 0 : index
    %695 = vector.load %arg3[%c424, %c0_152] : memref<512x128xf32, #tpu.memory_space<vmem>>, vector<1x64xf32>
    %c432 = arith.constant 432 : index
    %c0_153 = arith.constant 0 : index
    %696 = vector.load %arg3[%c432, %c0_153] : memref<512x128xf32, #tpu.memory_space<vmem>>, vector<1x64xf32>
    %697 = vector.extract_strided_slice %694 {offsets = [0, 0], sizes = [8, 32], strides = [1, 1]} : vector<8x64xf32> to vector<8x32xf32>
    %cst_154 = arith.constant dense<0.000000e+00> : vector<8xf32>
    %698 = vector.multi_reduction <add>, %697, %cst_154 [1] : vector<8x32xf32> to vector<8xf32>
    %699 = vector.shape_cast %698 : vector<8xf32> to vector<8x1xf32>
    %cst_155 = arith.constant 3.200000e+01 : f32
    %700 = vector.broadcast %cst_155 : f32 to vector<8x1xf32>
    %701 = arith.divf %699, %700 : vector<8x1xf32>
    %702 = vector.broadcast %701 : vector<8x1xf32> to vector<8x32xf32>
    %703 = arith.subf %697, %702 : vector<8x32xf32>
    %704 = arith.mulf %703, %703 : vector<8x32xf32>
    %cst_156 = arith.constant dense<0.000000e+00> : vector<8xf32>
    %705 = vector.multi_reduction <add>, %704, %cst_156 [1] : vector<8x32xf32> to vector<8xf32>
    %706 = vector.shape_cast %705 : vector<8xf32> to vector<8x1xf32>
    %cst_157 = arith.constant 3.200000e+01 : f32
    %707 = vector.broadcast %cst_157 : f32 to vector<8x1xf32>
    %708 = arith.divf %706, %707 : vector<8x1xf32>
    %709 = vector.broadcast %701 : vector<8x1xf32> to vector<8x32xf32>
    %710 = arith.subf %697, %709 : vector<8x32xf32>
    %cst_158 = arith.constant 9.99999974E-6 : f32
    %711 = vector.broadcast %cst_158 : f32 to vector<8x1xf32>
    %712 = arith.addf %708, %711 : vector<8x1xf32>
    %713 = math.rsqrt %712 : vector<8x1xf32>
    %714 = vector.broadcast %713 : vector<8x1xf32> to vector<8x32xf32>
    %715 = arith.mulf %710, %714 : vector<8x32xf32>
    %716 = vector.extract_strided_slice %694 {offsets = [0, 32], sizes = [8, 32], strides = [1, 1]} : vector<8x64xf32> to vector<8x32xf32>
    %cst_159 = arith.constant dense<0.000000e+00> : vector<8xf32>
    %717 = vector.multi_reduction <add>, %716, %cst_159 [1] : vector<8x32xf32> to vector<8xf32>
    %718 = vector.shape_cast %717 : vector<8xf32> to vector<8x1xf32>
    %cst_160 = arith.constant 3.200000e+01 : f32
    %719 = vector.broadcast %cst_160 : f32 to vector<8x1xf32>
    %720 = arith.divf %718, %719 : vector<8x1xf32>
    %721 = vector.broadcast %720 : vector<8x1xf32> to vector<8x32xf32>
    %722 = arith.subf %716, %721 : vector<8x32xf32>
    %723 = arith.mulf %722, %722 : vector<8x32xf32>
    %cst_161 = arith.constant dense<0.000000e+00> : vector<8xf32>
    %724 = vector.multi_reduction <add>, %723, %cst_161 [1] : vector<8x32xf32> to vector<8xf32>
    %725 = vector.shape_cast %724 : vector<8xf32> to vector<8x1xf32>
    %cst_162 = arith.constant 3.200000e+01 : f32
    %726 = vector.broadcast %cst_162 : f32 to vector<8x1xf32>
    %727 = arith.divf %725, %726 : vector<8x1xf32>
    %728 = vector.broadcast %720 : vector<8x1xf32> to vector<8x32xf32>
    %729 = arith.subf %716, %728 : vector<8x32xf32>
    %cst_163 = arith.constant 9.99999974E-6 : f32
    %730 = vector.broadcast %cst_163 : f32 to vector<8x1xf32>
    %731 = arith.addf %727, %730 : vector<8x1xf32>
    %732 = math.rsqrt %731 : vector<8x1xf32>
    %733 = vector.broadcast %732 : vector<8x1xf32> to vector<8x32xf32>
    %734 = arith.mulf %729, %733 : vector<8x32xf32>
    %735 = tpu.concatenate %715, %734 in 1 : vector<8x32xf32>, vector<8x32xf32> -> vector<8x64xf32>
    %736 = vector.broadcast %695 : vector<1x64xf32> to vector<8x64xf32>
    %737 = arith.mulf %735, %736 : vector<8x64xf32>
    %738 = vector.broadcast %696 : vector<1x64xf32> to vector<8x64xf32>
    %739 = arith.addf %737, %738 : vector<8x64xf32>
    %cst_164 = arith.constant 0.000000e+00 : f32
    %740 = vector.broadcast %cst_164 : f32 to vector<8x64xf32>
    %741 = arith.maximumf %739, %740 : vector<8x64xf32>
    %c440 = arith.constant 440 : index
    %c0_165 = arith.constant 0 : index
    %742 = vector.load %arg3[%c440, %c0_165] : memref<512x128xf32, #tpu.memory_space<vmem>>, vector<64x2xf32>
    %cst_166 = arith.constant dense<0.000000e+00> : vector<8x2xf32>
    %743 = tpu.matmul %741, %742, %cst_166 {dimension_numbers = #tpu.dot_dimension_numbers<[1], [0], [0], [1], [0, 0, 1, 1], [], []>} : vector<8x64xf32>, vector<64x2xf32>, vector<8x2xf32> -> vector<8x2xf32>
    %c504 = arith.constant 504 : index
    %c0_167 = arith.constant 0 : index
    %744 = vector.load %arg3[%c504, %c0_167] : memref<512x128xf32, #tpu.memory_space<vmem>>, vector<1x2xf32>
    %745 = vector.broadcast %744 : vector<1x2xf32> to vector<8x2xf32>
    %746 = arith.addf %743, %745 : vector<8x2xf32>
    %747 = arith.negf %746 : vector<8x2xf32>
    %748 = math.exp %747 : vector<8x2xf32>
    %cst_168 = arith.constant 1.000000e+00 : f32
    %749 = vector.broadcast %cst_168 : f32 to vector<8x2xf32>
    %750 = arith.addf %749, %748 : vector<8x2xf32>
    %751 = arith.divf %749, %750 : vector<8x2xf32>
    %752 = vector.extract_strided_slice %609 {offsets = [0, 8], sizes = [8, 1], strides = [1, 1]} : vector<8x128xf32> to vector<8x1xf32>
    %753 = vector.broadcast %752 : vector<8x1xf32> to vector<8x2xf32>
    %754 = arith.addf %751, %753 : vector<8x2xf32>
    %cst_169 = arith.constant 0.000000e+00 : f32
    %cst_170 = arith.constant 1.000000e+00 : f32
    %755 = vector.broadcast %cst_169 : f32 to vector<8x2xf32>
    %756 = arith.maximumf %755, %754 : vector<8x2xf32>
    %757 = vector.broadcast %cst_170 : f32 to vector<8x2xf32>
    %758 = arith.minimumf %757, %756 : vector<8x2xf32>
    %cst_171 = arith.constant 0.000000e+00 : f32
    %759 = vector.broadcast %cst_171 : f32 to vector<8x118xf32>
    %760 = tpu.concatenate %634, %758, %759 in 1 : vector<8x8xf32>, vector<8x2xf32>, vector<8x118xf32> -> vector<8x128xf32>
    %c0_172 = arith.constant 0 : index
    %c0_173 = arith.constant 0 : index
    %761 = vector.load %arg4[%c0_172, %c0_173] : memref<8x128xf32, #tpu.memory_space<vmem>>, vector<8x128xf32>
    tpu.vector_store %arg4[%c0_172, %c0_173], %760 {strides = array<i32>} : memref<8x128xf32, #tpu.memory_space<vmem>>, vector<8x128xf32>,
    return
  }
  func.func @transform_0(%arg0: i32) -> (i32, i32) {
    %c0_i32 = arith.constant 0 : i32
    %c0_i32_0 = arith.constant 0 : i32
    return %arg0, %c0_i32 : i32, i32
  }
  func.func @transform_1(%arg0: i32) -> (i32, i32) {
    %c0_i32 = arith.constant 0 : i32
    %c0_i32_0 = arith.constant 0 : i32
    return %arg0, %c0_i32 : i32, i32
  }
  func.func @transform_2(%arg0: i32) -> (i32, i32) {
    %c0_i32 = arith.constant 0 : i32
    %c0_i32_0 = arith.constant 0 : i32
    %c0_i32_1 = arith.constant 0 : i32
    return %c0_i32, %c0_i32_0 : i32, i32
  }
  func.func @transform_3(%arg0: i32) -> (i32, i32) {
    %c0_i32 = arith.constant 0 : i32
    %c0_i32_0 = arith.constant 0 : i32
    return %arg0, %c0_i32 : i32, i32
  }
}

</mosaic_0001>

<bundles_post_ra>
// kernel: _forward.1
= control target key start
LH: loop header
LB: loop body
LE: loop exit
PB: predicated region body
PF: predicated region fallthrough
CT: control target
= control target key end

     0   :  { %8 = vsyncpa [#allocation4], 0  ;;  %s3481_s12 = smov [#allocation3]   ;;  %s3905_s0 = inlined_call_operand.vmem [shape: f32[8,8], index: 0, kind: input, shape index: {}]   ;;  %s3906_s1 = inlined_call_operand.vmem [shape: f32[8,128], index: 1, kind: input, shape index: {}]   ;;  %s3907_s2 = inlined_call_operand.hbm [shape: f32[512,128], index: 2, kind: input, shape index: {}]   ;;  %s3908_s3 = inlined_call_operand.vmem [shape: f32[8,128], index: 3, kind: output, shape index: {}]  }
   0x1   :  { %s18_s13 = sshll.u32 %s3481_s12, 4  ;;  %s3457_s16 = scalar_lea.hbm %s3907_s2, 8192  ;;  %s19_s13 = int_to_ptr.vmem [resolvable:$true] %s18_s13 }
   0x2   :  { %p3458_p0 = scmp.ne.s32.totalorder %s3907_s2, %s3457_s16  ;;  %p3461_p1 = scmp.lt.u32.totalorder %s3457_s16, %s3907_s2 }
   0x4   :  { %p3463_p2 = pnand %p3461_p1, %p3458_p0 }
   0x6   :  { %3466 = shalt.err (!%p3463_p2)
}
   0x7   :  { %s3467_s21 = scalar_lea.vmem %s19_s13, 8192  ;;  %p3472_p4 = scmp.lt.s32.totalorder %s19_s13, %s19_s13 }
   0x8   :  { %p3468_p3 = scmp.ne.s32.totalorder %s19_s13, %s3467_s21  ;;  %p3473_p5 = scmp.lt.s32.totalorder %s3467_s21, %s3467_s21 }
   0xa   :  { %p3474_p6 = por %p3473_p5, %p3472_p4 }
   0xc   :  { %p3475_p7 = pnand %p3474_p6, %p3468_p3 }
   0xe   :  { %3478 = shalt.err (!%p3475_p7)
}
   0xf   :  { %s3482_s22 = smov 128   ;;  %s3483_s23 = smov 8  }
  0x10   :  { %24 = dma.hbm_to_vmem [thread:$0]  %s3907_s2, 8192, %s19_s13, [#allocation4], %s3482_s22, %s3482_s22, %s3483_s23  }
  0x11   :  { %3479 = dma.done.wait [#allocation4], 8192  }
  0x12   :  { %3480 = vsyncadd [#allocation4], 4294959104  ;;  %v3484_v0 = vmov 0.0|0.0   ;;  %vm3485_vm0 = vmmov 0   ;;  %v3486_v1 = vmov 0.0   ;;  %v3487_v2 = vmov 0  }
  0x13   :  { %3163 = vmatprep.subr.bf16.mxu0 %v3484_v0  ;;  %2888 = vmatprep.mubr.msk.f32.mxu0 %vm3485_vm0, %v3486_v1  ;;  %v29_v3 = vld [vmem:[#allocation3 + $0x8] sm:$0xff]  ;;  %v30_v4 = vld [vmem:[#allocation3 + $0x10] sm:$0xff]  ;;  %v31_v5 = vld [vmem:[#allocation3 + $0x18] sm:$0xff]  ;;  %s3489_s27 = smov 96   ;;  %v3490_v29 = vmov 1   ;;  %vm55_vm1 = vcmask 261120  }
  0x14   :  { %3332 = vset.pattern.permute.xlu0 %v3487_v2  ;;  %3169 = vmatprep.subr.bf16.mxu1 %v3484_v0  ;;  %v3537_v6 = vpack.c.bf16 %v30_v4, %v29_v3  ;;  %v32_v7 = vld [vmem:[#allocation3 + $0x20] sm:$0xff]  ;;  %v3562_v10 = vld [vmem:[#allocation3 + $0x30] ss:$0 sm:$0xff]  ;;  %v3569_v17 = vld [vmem:[#allocation3 + $0x28] ss:$0 sm:$0xff]  ;;  %v3491_v52 = vmov 2  }
  0x15   :  { %2899 = vmatprep.mubr.msk.f32.mxu1 %vm3485_vm0, %v3486_v1  ;;  %v3542_v8 = vld [vmem:[%s3905_s0] sm:$0xff]  ;;  %v3546_v9 = vpack.c.bf16 %v32_v7, %v31_v5  ;;  %s3488_s0 = smov 64   ;;  %3333 = vset.pattern.permute.xlu1 %v3490_v29  ;;  %vm2208_vm2 = vcmask 64512   ;;  %vm2447_vm6 = vcmask 523264   ;;  %vm2674_vm7 = vcmask 80896  }
  0x16   :  { %38 = vperm.xlu0 %3332, %v3542_v8   ;;  %3165 = vmatpush3.bf16.msra.mxu0 %v3537_v6  ;;  %v3566_v15 = vld [vmem:[#allocation3] ss:$0 sm:$0xff] }
  0x17   :  { %3171 = vmatpush3.bf16.msra.mxu1 %v3537_v6  ;;  %3166 = vmatprep.subr.bf16.mxu0 %v3484_v0 }
  0x18   :  { %3172 = vmatprep.subr.bf16.mxu1 %v3484_v0 }
  0x1a   :  { %3168 = vmatpush3.bf16.msra.mxu0 %v3546_v9  ;;  %3334 = vset.pattern.permute.xlu0 %v3491_v52 }
  0x1b   :  { %3174 = vmatpush3.bf16.msra.mxu1 %v3546_v9  ;;  %3175 = vmatprep.subr.bf16.mxu0 %v3484_v0 }
  0x1c   :  { %3181 = vmatprep.subr.bf16.mxu1 %v3484_v0 }
  0x1d   :  { %2889 = vmatmul.mubr.f32.vlgmr.msra.gmra.mrb[0].mxu0 %v3486_v1 }
  0x1e   :  { %3177 = vmatpush3.bf16.msra.mxu0 %v3537_v6  ;;  %2910 = vmatprep.mubr.msk.f32.mxu0 %vm3485_vm0, %v3486_v1 }
  0x1f   :  { %3178 = vmatprep.subr.bf16.mxu0 %v3484_v0 }
  0x22   :  { %3180 = vmatpush3.bf16.msra.mxu0 %v3546_v9 }
  0x23   :  { %3187 = vmatprep.subr.bf16.mxu0 %v3484_v0 }
  0x95   :  { %v39_v14 = vpop.permute.xlu0 %38 }
  0x96   :  { %v45_v16 = vmul.f32 %v3566_v15, %v39_v14 }
  0x98   :  { %v50_v18 = vadd.f32 %v3569_v17, %v45_v16 }
  0xf0   :  { %v125_v11 = vpop.f32.mrb[0].mxu0 }
  0xf1   :  { %v126_v12 = vadd.f32 %v3562_v10, %v125_v11  ;;  %v2890_v13 = vpop.f32.mrb[1].mxu0 }
  0xf3   :  { %137 = vrot.lane.b32.xlu0 %v126_v12, %s3488_s0  ;;  %v129_v19 = vadd.f32 %v126_v12, %v50_v18 }
  0xf5   :  { %v2685_v20 = vmul.f32 -1.442695, %v129_v19  ;;  %v3492_v19 = vmov 3  }
  0xf7   :  { %3341 = vpow2.f32 %v2685_v20 }
 0x101   :  { %v3342_v21 = vpop.eup %3341 }
 0x102   :  { %v133_v22 = vadd.f32 1.0, %v3342_v21 }
 0x104   :  { %3343 = vrcp.f32 %v133_v22 }
 0x10e   :  { %v3344_v23 = vpop.eup %3343 }
 0x10f   :  { %v147_v30 = vsub.f32 1.0, %v3344_v23  ;;  %v153_v32 = vmul.f32 0.0, %v3344_v23 }
 0x165   :  { %v138_v24 = vpop.permute.xlu0 %137 }
 0x166   :  { %v140_v25 = vmul.f32 %v3344_v23, %v138_v24 }
 0x168   :  { %142 = vrot.lane.b32.xlu1 %v140_v25, %s3488_s0 }
 0x1da   :  { %v143_v26 = vpop.permute.xlu1 %142 }
 0x1db   :  { %v145_v27 = vadd.f32 %v143_v26, %v50_v18 }
 0x1dd   :  { %3345 = vtanh.f32 %v145_v27 }
 0x1e7   :  { %v3346_v28 = vpop.eup %3345 }
 0x1e8   :  { %149 = vrot.lane.b32.xlu1 %v3346_v28, %s3489_s27 }
 0x1ec   :  { %163 = vperm.xlu1 %3333, %v3542_v8  }
 0x25a   :  { %v150_v31 = vpop.permute.xlu1 %149 }
 0x25b   :  { %v152_v33 = vmul.f32 %v150_v31, %v147_v30 }
 0x25d   :  { %v154_v34 = vadd.f32 %v153_v32, %v152_v33 }
 0x25f   :  { %156 = vrot.lane.b32.xlu0 %v154_v34, %s3489_s27 }
 0x26b   :  { %v164_v39 = vpop.permute.xlu1 %163 }
 0x26c   :  { %v166_v40 = vmul.f32 %v3566_v15, %v164_v39 }
 0x26e   :  { %v167_v41 = vadd.f32 %v3569_v17, %v166_v40 }
 0x2d1   :  { %v157_v35 = vpop.permute.xlu0 %156 }
 0x2d2   :  { %159 = vst.msk [vmem:[#allocation2] sm:$0xff] %vm55_vm1, %v157_v35  ;;  %2900 = vmatmul.mubr.msk.f32.vlgmr.msra.gmra.mrb[0].mxu1 %vm55_vm1, %v157_v35 }
 0x2d3   :  { %3183 = vmatpush3.bf16.msra.mxu1 %v3537_v6  ;;  %2921 = vmatprep.mubr.msk.f32.mxu1 %vm3485_vm0, %v3486_v1 }
 0x2d4   :  { %3184 = vmatprep.subr.bf16.mxu1 %v3484_v0 }
 0x2d7   :  { %3186 = vmatpush3.bf16.msra.mxu1 %v3546_v9 }
 0x2d8   :  { %3193 = vmatprep.subr.bf16.mxu1 %v3484_v0 }
 0x3a5   :  { %v236_v36 = vpop.f32.mrb[0].mxu1 }
 0x3a6   :  { %v237_v37 = vadd.f32 %v3562_v10, %v236_v36  ;;  %v2901_v38 = vpop.f32.mrb[1].mxu1 }
 0x3a8   :  { %248 = vrot.lane.b32.xlu0 %v237_v37, %s3488_s0  ;;  %v240_v42 = vadd.f32 %v237_v37, %v167_v41 }
 0x3aa   :  { %v2687_v43 = vmul.f32 -1.442695, %v240_v42  ;;  %v3493_v42 = vmov 4  }
 0x3ac   :  { %3347 = vpow2.f32 %v2687_v43 }
 0x3b6   :  { %v3348_v44 = vpop.eup %3347 }
 0x3b7   :  { %v244_v45 = vadd.f32 1.0, %v3348_v44 }
 0x3b9   :  { %3349 = vrcp.f32 %v244_v45 }
 0x3c3   :  { %v3350_v46 = vpop.eup %3349 }
 0x3c4   :  { %v258_v53 = vsub.f32 1.0, %v3350_v46  ;;  %v264_v55 = vmul.f32 %v3350_v46, %v154_v34 }
 0x41a   :  { %v249_v47 = vpop.permute.xlu0 %248 }
 0x41b   :  { %v251_v48 = vmul.f32 %v3350_v46, %v249_v47 }
 0x41d   :  { %253 = vrot.lane.b32.xlu1 %v251_v48, %s3488_s0 }
 0x48f   :  { %v254_v49 = vpop.permute.xlu1 %253 }
 0x490   :  { %v256_v50 = vadd.f32 %v254_v49, %v167_v41 }
 0x492   :  { %3351 = vtanh.f32 %v256_v50 }
 0x49c   :  { %v3352_v51 = vpop.eup %3351 }
 0x49d   :  { %260 = vrot.lane.b32.xlu0 %v3352_v51, %s3489_s27 }
 0x4a1   :  { %274 = vperm.xlu0 %3334, %v3542_v8  }
 0x4a5   :  { %3335 = vset.pattern.permute.xlu0 %v3492_v19 }
 0x50f   :  { %v261_v54 = vpop.permute.xlu0 %260 }
 0x510   :  { %v263_v56 = vmul.f32 %v261_v54, %v258_v53 }
 0x512   :  { %v265_v57 = vadd.f32 %v264_v55, %v263_v56 }
 0x514   :  { %267 = vrot.lane.b32.xlu1 %v265_v57, %s3489_s27 }
 0x520   :  { %v275_v62 = vpop.permute.xlu0 %274 }
 0x521   :  { %v277_v63 = vmul.f32 %v3566_v15, %v275_v62 }
 0x523   :  { %v278_v2 = vadd.f32 %v3569_v17, %v277_v63 }
 0x586   :  { %v268_v58 = vpop.permute.xlu1 %267 }
 0x587   :  { %270 = vst.msk [vmem:[#allocation2 + $0x8] sm:$0xff] %vm55_vm1, %v268_v58  ;;  %2911 = vmatmul.mubr.msk.f32.vlgmr.msra.gmra.mrb[2].mxu0 %vm55_vm1, %v268_v58 }
 0x588   :  { %3189 = vmatpush3.bf16.msra.mxu0 %v3537_v6  ;;  %2932 = vmatprep.mubr.msk.f32.mxu0 %vm3485_vm0, %v3486_v1 }
 0x589   :  { %3190 = vmatprep.subr.bf16.mxu0 %v3484_v0 }
 0x58c   :  { %3192 = vmatpush3.bf16.msra.mxu0 %v3546_v9 }
 0x58d   :  { %3199 = vmatprep.subr.bf16.mxu0 %v3484_v0 }
 0x65a   :  { %v347_v59 = vpop.f32.mrb[2].mxu0 }
 0x65b   :  { %v348_v60 = vadd.f32 %v3562_v10, %v347_v59  ;;  %v2912_v61 = vpop.f32.mrb[3].mxu0 }
 0x65d   :  { %359 = vrot.lane.b32.xlu1 %v348_v60, %s3488_s0  ;;  %v351_v3 = vadd.f32 %v348_v60, %v278_v2 }
 0x65f   :  { %v2689_v4 = vmul.f32 -1.442695, %v351_v3  ;;  %v3494_v3 = vmov 5  }
 0x661   :  { %3353 = vpow2.f32 %v2689_v4 }
 0x66b   :  { %v3354_v5 = vpop.eup %3353 }
 0x66c   :  { %v355_v7 = vadd.f32 1.0, %v3354_v5 }
 0x66e   :  { %3355 = vrcp.f32 %v355_v7 }
 0x678   :  { %v3356_v11 = vpop.eup %3355 }
 0x679   :  { %v369_v20 = vsub.f32 1.0, %v3356_v11  ;;  %v375_v22 = vmul.f32 %v3356_v11, %v265_v57 }
 0x6cf   :  { %v360_v12 = vpop.permute.xlu1 %359 }
 0x6d0   :  { %v362_v13 = vmul.f32 %v3356_v11, %v360_v12 }
 0x6d2   :  { %364 = vrot.lane.b32.xlu1 %v362_v13, %s3488_s0 }
 0x744   :  { %v365_v14 = vpop.permute.xlu1 %364 }
 0x745   :  { %v367_v16 = vadd.f32 %v365_v14, %v278_v2 }
 0x747   :  { %3357 = vtanh.f32 %v367_v16 }
 0x751   :  { %v3358_v18 = vpop.eup %3357 }
 0x752   :  { %371 = vrot.lane.b32.xlu0 %v3358_v18, %s3489_s27 }
 0x756   :  { %385 = vperm.xlu0 %3335, %v3542_v8  }
 0x75a   :  { %3336 = vset.pattern.permute.xlu0 %v3493_v42 }
 0x7c4   :  { %v372_v21 = vpop.permute.xlu0 %371 }
 0x7c5   :  { %v374_v23 = vmul.f32 %v372_v21, %v369_v20 }
 0x7c7   :  { %v376_v24 = vadd.f32 %v375_v22, %v374_v23 }
 0x7c9   :  { %378 = vrot.lane.b32.xlu1 %v376_v24, %s3489_s27 }
 0x7d5   :  { %v386_v29 = vpop.permute.xlu0 %385 }
 0x7d6   :  { %v388_v30 = vmul.f32 %v3566_v15, %v386_v29  ;;  %v937_v29 = vld [vmem:[#allocation3 + $0x38] sm:$0xff] }
 0x7d8   :  { %v389_v31 = vadd.f32 %v3569_v17, %v388_v30  ;;  %v938_v30 = vld [vmem:[#allocation3 + $0x40] sm:$0xff] }
 0x83b   :  { %v379_v25 = vpop.permute.xlu1 %378 }
 0x83c   :  { %381 = vst.msk [vmem:[#allocation2 + $0x10] sm:$0xff] %vm55_vm1, %v379_v25  ;;  %2922 = vmatmul.mubr.msk.f32.vlgmr.msra.gmra.mrb[2].mxu1 %vm55_vm1, %v379_v25 }
 0x83d   :  { %3195 = vmatpush3.bf16.msra.mxu1 %v3537_v6  ;;  %2943 = vmatprep.mubr.msk.f32.mxu1 %vm3485_vm0, %v3486_v1 }
 0x83e   :  { %3196 = vmatprep.subr.bf16.mxu1 %v3484_v0 }
 0x841   :  { %3198 = vmatpush3.bf16.msra.mxu1 %v3546_v9 }
 0x842   :  { %3205 = vmatprep.subr.bf16.mxu1 %v3484_v0 }
 0x90f   :  { %v458_v26 = vpop.f32.mrb[2].mxu1 }
 0x910   :  { %v459_v27 = vadd.f32 %v3562_v10, %v458_v26  ;;  %v2923_v28 = vpop.f32.mrb[3].mxu1 }
 0x912   :  { %470 = vrot.lane.b32.xlu1 %v459_v27, %s3488_s0  ;;  %v462_v32 = vadd.f32 %v459_v27, %v389_v31 }
 0x914   :  { %v2691_v33 = vmul.f32 -1.442695, %v462_v32 }
 0x916   :  { %3359 = vpow2.f32 %v2691_v33 }
 0x920   :  { %v3360_v34 = vpop.eup %3359 }
 0x921   :  { %v466_v35 = vadd.f32 1.0, %v3360_v34 }
 0x923   :  { %3361 = vrcp.f32 %v466_v35 }
 0x92d   :  { %v3362_v36 = vpop.eup %3361 }
 0x92e   :  { %v480_v43 = vsub.f32 1.0, %v3362_v36  ;;  %v486_v45 = vmul.f32 %v3362_v36, %v376_v24 }
 0x984   :  { %v471_v37 = vpop.permute.xlu1 %470 }
 0x985   :  { %v473_v38 = vmul.f32 %v3362_v36, %v471_v37 }
 0x987   :  { %475 = vrot.lane.b32.xlu1 %v473_v38, %s3488_s0  ;;  %v3495_v38 = vmov 6  }
 0x9f9   :  { %v476_v39 = vpop.permute.xlu1 %475 }
 0x9fa   :  { %v478_v40 = vadd.f32 %v476_v39, %v389_v31  ;;  %v3211_v31 = vpack.c.bf16 %v938_v30, %v937_v29  ;;  %v939_v39 = vld [vmem:[#allocation3 + $0x48] sm:$0xff] }
 0x9fc   :  { %3363 = vtanh.f32 %v478_v40  ;;  %v940_v40 = vld [vmem:[#allocation3 + $0x50] sm:$0xff] }
 0xa06   :  { %v3364_v41 = vpop.eup %3363 }
 0xa07   :  { %482 = vrot.lane.b32.xlu0 %v3364_v41, %s3489_s27  ;;  %v3215_v41 = vpack.c.bf16 %v940_v40, %v939_v39 }
 0xa0b   :  { %496 = vperm.xlu0 %3336, %v3542_v8  }
 0xa0f   :  { %3337 = vset.pattern.permute.xlu0 %v3494_v3 }
 0xa79   :  { %v483_v44 = vpop.permute.xlu0 %482 }
 0xa7a   :  { %v485_v46 = vmul.f32 %v483_v44, %v480_v43  ;;  %v947_v43 = vld [vmem:[#allocation2] sm:$0xff]  ;;  %v948_v44 = vld [vmem:[#allocation2 + $0x8] sm:$0xff] }
 0xa7c   :  { %v487_v47 = vadd.f32 %v486_v45, %v485_v46  ;;  %v949_v45 = vld [vmem:[#allocation2 + $0x10] sm:$0xff] }
 0xa7e   :  { %489 = vrot.lane.b32.xlu1 %v487_v47, %s3489_s27 }
 0xa8a   :  { %v497_v52 = vpop.permute.xlu0 %496 }
 0xa8b   :  { %v499_v53 = vmul.f32 %v3566_v15, %v497_v52 }
 0xa8d   :  { %v500_v54 = vadd.f32 %v3569_v17, %v499_v53 }
 0xaf0   :  { %v490_v48 = vpop.permute.xlu1 %489 }
 0xaf1   :  { %492 = vst.msk [vmem:[#allocation2 + $0x18] sm:$0xff] %vm55_vm1, %v490_v48  ;;  %2933 = vmatmul.mubr.msk.f32.vlgmr.msra.gmra.mrb[4].mxu0 %vm55_vm1, %v490_v48 }
 0xaf2   :  { %3201 = vmatpush3.bf16.msra.mxu0 %v3537_v6  ;;  %2954 = vmatprep.mubr.msk.f32.mxu0 %vm3485_vm0, %v3486_v1 }
 0xaf3   :  { %3202 = vmatprep.subr.bf16.mxu0 %v3484_v0 }
 0xaf6   :  { %3204 = vmatpush3.bf16.msra.mxu0 %v3546_v9 }
 0xaf7   :  { %3212 = vmatprep.subr.bf16.mxu0 %v3211_v31 }
 0xaf8   :  { %v950_v46 = vld [vmem:[#allocation2 + $0x18] sm:$0xff] }
 0xbc4   :  { %v569_v49 = vpop.f32.mrb[4].mxu0 }
 0xbc5   :  { %v570_v50 = vadd.f32 %v3562_v10, %v569_v49  ;;  %v2934_v51 = vpop.f32.mrb[5].mxu0 }
 0xbc7   :  { %581 = vrot.lane.b32.xlu1 %v570_v50, %s3488_s0  ;;  %v573_v55 = vadd.f32 %v570_v50, %v500_v54 }
 0xbc9   :  { %v2693_v56 = vmul.f32 -1.442695, %v573_v55 }
 0xbcb   :  { %3365 = vpow2.f32 %v2693_v56 }
 0xbd5   :  { %v3366_v57 = vpop.eup %3365 }
 0xbd6   :  { %v577_v58 = vadd.f32 1.0, %v3366_v57 }
 0xbd8   :  { %3367 = vrcp.f32 %v577_v58 }
 0xbe2   :  { %v3368_v59 = vpop.eup %3367 }
 0xbe3   :  { %v591_v4 = vsub.f32 1.0, %v3368_v59  ;;  %v597_v7 = vmul.f32 %v3368_v59, %v487_v47 }
 0xc39   :  { %v582_v60 = vpop.permute.xlu1 %581 }
 0xc3a   :  { %v584_v61 = vmul.f32 %v3368_v59, %v582_v60 }
 0xc3c   :  { %586 = vrot.lane.b32.xlu1 %v584_v61, %s3488_s0 }
 0xcae   :  { %v587_v62 = vpop.permute.xlu1 %586 }
 0xcaf   :  { %v589_v63 = vadd.f32 %v587_v62, %v500_v54 }
 0xcb1   :  { %3369 = vtanh.f32 %v589_v63 }
 0xcbb   :  { %v3370_v2 = vpop.eup %3369 }
 0xcbc   :  { %593 = vrot.lane.b32.xlu0 %v3370_v2, %s3489_s27 }
 0xcc0   :  { %607 = vperm.xlu0 %3337, %v3542_v8  }
 0xcc4   :  { %3338 = vset.pattern.permute.xlu0 %v3495_v38 }
 0xd2e   :  { %v594_v5 = vpop.permute.xlu0 %593 }
 0xd2f   :  { %v596_v11 = vmul.f32 %v594_v5, %v591_v4 }
 0xd31   :  { %v598_v12 = vadd.f32 %v597_v7, %v596_v11 }
 0xd33   :  { %600 = vrot.lane.b32.xlu1 %v598_v12, %s3489_s27 }
 0xd3f   :  { %v608_v19 = vpop.permute.xlu0 %607 }
 0xd40   :  { %v610_v20 = vmul.f32 %v3566_v15, %v608_v19  ;;  %v944_v19 = vld [vmem:[#allocation3 + $0x70] sm:$0xff] }
 0xda5   :  { %v601_v13 = vpop.permute.xlu1 %600 }
 0xda6   :  { %603 = vst.msk [vmem:[#allocation2 + $0x20] sm:$0xff] %vm55_vm1, %v601_v13  ;;  %2944 = vmatmul.mubr.msk.f32.vlgmr.msra.gmra.mrb[4].mxu1 %vm55_vm1, %v601_v13  ;;  %v941_v13 = vld [vmem:[#allocation3 + $0x58] sm:$0xff] }
 0xda7   :  { %3207 = vmatpush3.bf16.msra.mxu1 %v3537_v6  ;;  %2965 = vmatprep.mubr.msk.f32.mxu1 %vm3485_vm0, %v3486_v1  ;;  %v611_v6 = vadd.f32 %v3569_v17, %v610_v20 }
 0xda8   :  { %3208 = vmatprep.subr.bf16.mxu1 %v3484_v0 }
 0xdab   :  { %3210 = vmatpush3.bf16.msra.mxu1 %v3546_v9 }
 0xdac   :  { %3219 = vmatprep.subr.bf16.mxu1 %v3484_v0 }
 0xdad   :  { %v951_v47 = vld [vmem:[#allocation2 + $0x20] sm:$0xff] }
 0xe79   :  { %v680_v14 = vpop.f32.mrb[4].mxu1 }
 0xe7a   :  { %v681_v16 = vadd.f32 %v3562_v10, %v680_v14  ;;  %v2945_v18 = vpop.f32.mrb[5].mxu1  ;;  %v942_v14 = vld [vmem:[#allocation3 + $0x60] sm:$0xff] }
 0xe7b   :  { %v943_v18 = vld [vmem:[#allocation3 + $0x68] sm:$0xff] }
 0xe7c   :  { %692 = vrot.lane.b32.xlu1 %v681_v16, %s3488_s0  ;;  %v684_v21 = vadd.f32 %v681_v16, %v611_v6  ;;  %v3685_v16 = vpack.c.bf16 %v942_v14, %v941_v13  ;;  %v3689_v20 = vpack.c.bf16 %v944_v19, %v943_v18 }
 0xe7e   :  { %v2695_v22 = vmul.f32 -1.442695, %v684_v21 }
 0xe80   :  { %3371 = vpow2.f32 %v2695_v22 }
 0xe8a   :  { %v3372_v23 = vpop.eup %3371 }
 0xe8b   :  { %v688_v24 = vadd.f32 1.0, %v3372_v23 }
 0xe8d   :  { %3373 = vrcp.f32 %v688_v24 }
 0xe97   :  { %v3374_v9 = vpop.eup %3373 }
 0xe98   :  { %v702_v33 = vsub.f32 1.0, %v3374_v9  ;;  %v708_v35 = vmul.f32 %v3374_v9, %v598_v12 }
 0xeee   :  { %v693_v25 = vpop.permute.xlu1 %692 }
 0xeef   :  { %v695_v26 = vmul.f32 %v3374_v9, %v693_v25 }
 0xef1   :  { %697 = vrot.lane.b32.xlu1 %v695_v26, %s3488_s0 }
 0xf63   :  { %v698_v27 = vpop.permute.xlu1 %697 }
 0xf64   :  { %v700_v28 = vadd.f32 %v698_v27, %v611_v6 }
 0xf66   :  { %3375 = vtanh.f32 %v700_v28  ;;  %v3714_v28 = vld [vmem:[#allocation3 + $0x80] ss:$0 sm:$0xff] }
 0xf70   :  { %v3376_v32 = vpop.eup %3375 }
 0xf71   :  { %704 = vrot.lane.b32.xlu0 %v3376_v32, %s3489_s27  ;;  %v3718_v32 = vld [vmem:[#allocation3 + $0x78] ss:$0 sm:$0xff] }
 0xf75   :  { %718 = vperm.xlu0 %3338, %v3542_v8  }
 0xfe3   :  { %v705_v34 = vpop.permute.xlu0 %704 }
 0xfe4   :  { %v707_v36 = vmul.f32 %v705_v34, %v702_v33 }
 0xfe6   :  { %v3653_v37 = vadd.f32 %v708_v35, %v707_v36 }
 0xfe8   :  { %711 = vrot.lane.b32.xlu1 %v3653_v37, %s3489_s27 }
 0xff4   :  { %v719_v58 = vpop.permute.xlu0 %718 }
 0xff5   :  { %v721_v59 = vmul.f32 %v3566_v15, %v719_v58 }
 0xff7   :  { %v722_v60 = vadd.f32 %v3569_v17, %v721_v59 }
0x105a   :  { %v712_v42 = vpop.permute.xlu1 %711 }
0x105b   :  { %714 = vst.msk [vmem:[#allocation2 + $0x28] sm:$0xff] %vm55_vm1, %v712_v42  ;;  %2955 = vmatmul.mubr.msk.f32.vlgmr.msra.gmra.mrb[6].mxu0 %vm55_vm1, %v712_v42 }
0x105c   :  { %3214 = vmatpush3.bf16.msra.mxu0 %v3211_v31  ;;  %2976 = vmatprep.mubr.msk.f32.mxu0 %vm55_vm1, %v947_v43 }
0x105d   :  { %3216 = vmatprep.subr.bf16.mxu0 %v3215_v41 }
0x1060   :  { %3218 = vmatpush3.bf16.msra.mxu0 %v3215_v41  ;;  %v3496_v41 = vmov 7  }
0x1061   :  { %3231 = vmatprep.subr.bf16.mxu0 %v3484_v0  ;;  %3339 = vset.pattern.permute.xlu0 %v3496_v41 }
0x1062   :  { %v952_v48 = vld [vmem:[#allocation2 + $0x28] sm:$0xff] }
0x1063   :  { %2977 = vmatmul.mubr.msk.f32.vlgmr.msra.gmra.mrb[8].mxu0 %vm55_vm1, %v948_v44 }
0x1064   :  { %2979 = vmatprep.mubr.msk.f32.mxu0 %vm55_vm1, %v949_v45  ;;  %3233 = vmatpush3.bf16.msra.mxu0 %v3685_v16 }
0x1065   :  { %3234 = vmatprep.subr.bf16.mxu0 %v3484_v0 }
0x1067   :  { %2980 = vmatmul.mubr.msk.f32.gmra.mrb[10].mxu0 %vm55_vm1, %v950_v46 }
0x1068   :  { %2982 = vmatprep.mubr.msk.f32.mxu0 %vm55_vm1, %v951_v47  ;;  %3236 = vmatpush3.bf16.msra.mxu0 %v3689_v20 }
0x1069   :  { %3243 = vmatprep.subr.bf16.mxu0 %v3484_v0 }
0x106b   :  { %2983 = vmatmul.mubr.msk.f32.gmra.mrb[12].mxu0 %vm55_vm1, %v952_v48 }
0x112e   :  { %v791_v49 = vpop.f32.mrb[6].mxu0 }
0x112f   :  { %v792_v50 = vadd.f32 %v3562_v10, %v791_v49  ;;  %v2956_v51 = vpop.f32.mrb[7].mxu0 }
0x1131   :  { %803 = vrot.lane.b32.xlu1 %v792_v50, %s3488_s0  ;;  %v795_v61 = vadd.f32 %v792_v50, %v722_v60 }
0x1133   :  { %v2697_v62 = vmul.f32 -1.442695, %v795_v61 }
0x1135   :  { %3377 = vpow2.f32 %v2697_v62 }
0x1136   :  { %v3669_v52 = vpop.f32.mrb[8].mxu0 }
0x1137   :  { %v3671_v53 = vpop.f32.mrb[9].mxu0  ;;  %v1055_v19 = vadd.f32 %v3669_v52, %v3718_v32 }
0x1138   :  { %v1050_v33 = vadd.f32 %v3718_v32, %v3671_v53 }
0x113a   :  { %v3673_v54 = vpop.f32.mrb[10].mxu0 }
0x113b   :  { %v3675_v55 = vpop.f32.mrb[11].mxu0 }
0x113e   :  { %v3677_v56 = vpop.f32.mrb[12].mxu0 }
0x113f   :  { %v3679_v57 = vpop.f32.mrb[13].mxu0  ;;  %v3378_v63 = vpop.eup %3377 }
0x1140   :  { %v799_v2 = vadd.f32 1.0, %v3378_v63 }
0x1142   :  { %3379 = vrcp.f32 %v799_v2 }
0x114c   :  { %v3380_v3 = vpop.eup %3379 }
0x114d   :  { %v813_v6 = vsub.f32 1.0, %v3380_v3  ;;  %v819_v22 = vmul.f32 %v3380_v3, %v3653_v37 }
0x11a3   :  { %v804_v4 = vpop.permute.xlu1 %803 }
0x11a4   :  { %v806_v5 = vmul.f32 %v3380_v3, %v804_v4 }
0x11a6   :  { %808 = vrot.lane.b32.xlu1 %v806_v5, %s3488_s0 }
0x1218   :  { %v809_v7 = vpop.permute.xlu1 %808 }
0x1219   :  { %v811_v11 = vadd.f32 %v809_v7, %v722_v60 }
0x121b   :  { %3381 = vtanh.f32 %v811_v11 }
0x1225   :  { %v3382_v12 = vpop.eup %3381 }
0x1226   :  { %815 = vrot.lane.b32.xlu0 %v3382_v12, %s3489_s27 }
0x1298   :  { %v816_v21 = vpop.permute.xlu0 %815 }
0x1299   :  { %v818_v23 = vmul.f32 %v816_v21, %v813_v6 }
0x129b   :  { %v3694_v24 = vadd.f32 %v819_v22, %v818_v23 }
0x129d   :  { %822 = vrot.lane.b32.xlu1 %v3694_v24, %s3489_s27 }
0x130f   :  { %v823_v9 = vpop.permute.xlu1 %822 }
0x1310   :  { %825 = vst.msk [vmem:[#allocation2 + $0x30] sm:$0xff] %vm55_vm1, %v823_v9  ;;  %2966 = vmatmul.mubr.msk.f32.vlgmr.msra.gmra.mrb[6].mxu1 %vm55_vm1, %v823_v9 }
0x1311   :  { %3221 = vmatpush3.bf16.msra.mxu1 %v3685_v16  ;;  %2996 = vmatprep.mubr.msk.f32.mxu1 %vm3485_vm0, %v3486_v1 }
0x1312   :  { %3222 = vmatprep.subr.bf16.mxu1 %v3484_v0 }
0x1315   :  { %3224 = vmatpush3.bf16.msra.mxu1 %v3689_v20 }
0x1316   :  { %3225 = vmatprep.subr.bf16.mxu1 %v3484_v0 }
0x1317   :  { %v953_v25 = vld [vmem:[#allocation2 + $0x30] sm:$0xff] }
0x1318   :  { %2997 = vmatmul.mubr.f32.vlgmr.msra.gmra.mrb[8].mxu1 %v3486_v1  ;;  %2985 = vmatprep.mubr.msk.f32.mxu0 %vm55_vm1, %v953_v25 }
0x1319   :  { %3227 = vmatpush3.bf16.msra.mxu1 %v3685_v16  ;;  %3007 = vmatprep.mubr.msk.f32.mxu1 %vm3485_vm0, %v3486_v1 }
0x131a   :  { %3228 = vmatprep.subr.bf16.mxu1 %v3484_v0 }
0x131d   :  { %3230 = vmatpush3.bf16.msra.mxu1 %v3689_v20 }
0x131e   :  { %3237 = vmatprep.subr.bf16.mxu1 %v3484_v0 }
0x13e3   :  { %v902_v26 = vpop.f32.mrb[6].mxu1 }
0x13e4   :  { %v2967_v27 = vpop.f32.mrb[7].mxu1  ;;  %v903_v50 = vadd.f32 %v3562_v10, %v902_v26 }
0x13eb   :  { %v1158_v29 = vpop.f32.mrb[8].mxu1 }
0x13ec   :  { %v1159_v30 = vadd.f32 %v3714_v28, %v1158_v29  ;;  %v2998_v31 = vpop.f32.mrb[9].mxu1 }
0x13ee   :  { %1170 = vrot.lane.b32.xlu0 %v1159_v30, %s3488_s0  ;;  %v1162_v34 = vadd.f32 %v1159_v30, %v1050_v33 }
0x13f0   :  { %v2710_v35 = vmul.f32 -1.442695, %v1162_v34 }
0x13f2   :  { %3383 = vpow2.f32 %v2710_v35 }
0x13fc   :  { %v3384_v36 = vpop.eup %3383 }
0x13fd   :  { %v1166_v37 = vadd.f32 1.0, %v3384_v36 }
0x13ff   :  { %3385 = vrcp.f32 %v1166_v37 }
0x1409   :  { %v3386_v38 = vpop.eup %3385 }
0x140a   :  { %v1180_v45 = vsub.f32 1.0, %v3386_v38  ;;  %v1186_v47 = vmul.f32 0.0, %v3386_v38 }
0x1460   :  { %v1171_v39 = vpop.permute.xlu0 %1170 }
0x1461   :  { %v1173_v40 = vmul.f32 %v3386_v38, %v1171_v39 }
0x1463   :  { %1175 = vrot.lane.b32.xlu1 %v1173_v40, %s3488_s0 }
0x14d5   :  { %v1176_v42 = vpop.permute.xlu1 %1175 }
0x14d6   :  { %v1178_v43 = vadd.f32 %v1176_v42, %v1050_v33 }
0x14d8   :  { %3387 = vtanh.f32 %v1178_v43  ;;  %v1060_v43 = vadd.f32 %v3718_v32, %v3675_v55 }
0x14e2   :  { %v3388_v44 = vpop.eup %3387 }
0x14e3   :  { %1182 = vrot.lane.b32.xlu0 %v3388_v44, %s3489_s27 }
0x14e7   :  { %829 = vperm.xlu0 %3339, %v3542_v8  }
0x1555   :  { %v1183_v46 = vpop.permute.xlu0 %1182 }
0x1556   :  { %v1185_v48 = vmul.f32 %v1183_v46, %v1180_v45 }
0x1558   :  { %v1187_v49 = vadd.f32 %v1186_v47, %v1185_v48 }
0x155a   :  { %1189 = vrot.lane.b32.xlu1 %v1187_v49, %s3489_s27 }
0x155e   :  { %914 = vrot.lane.b32.xlu1 %v903_v50, %s3488_s0 }
0x1566   :  { %v830_v51 = vpop.permute.xlu0 %829 }
0x1567   :  { %v832_v53 = vmul.f32 %v3566_v15, %v830_v51 }
0x1569   :  { %v833_v58 = vadd.f32 %v3569_v17, %v832_v53 }
0x156b   :  { %v906_v59 = vadd.f32 %v903_v50, %v833_v58 }
0x156d   :  { %v2699_v60 = vmul.f32 -1.442695, %v906_v59 }
0x156f   :  { %3389 = vpow2.f32 %v2699_v60 }
0x1579   :  { %v3390_v8 = vpop.eup %3389 }
0x157a   :  { %v910_v61 = vadd.f32 1.0, %v3390_v8 }
0x157c   :  { %3391 = vrcp.f32 %v910_v61 }
0x1586   :  { %v3392_v10 = vpop.eup %3391 }
0x1587   :  { %v924_v11 = vsub.f32 1.0, %v3392_v10  ;;  %v930_v13 = vmul.f32 %v3392_v10, %v3694_v24 }
0x15cc   :  { %v1190_v62 = vpop.permute.xlu1 %1189 }
0x15cd   :  { %3008 = vmatmul.mubr.msk.f32.vlgmr.msra.gmra.mrb[10].mxu1 %vm55_vm1, %v1190_v62 }
0x15ce   :  { %3239 = vmatpush3.bf16.msra.mxu1 %v3685_v16  ;;  %3029 = vmatprep.mubr.msk.f32.mxu1 %vm3485_vm0, %v3486_v1 }
0x15cf   :  { %3240 = vmatprep.subr.bf16.mxu1 %v3484_v0 }
0x15d0   :  { %v915_v15 = vpop.permute.xlu1 %914 }
0x15d1   :  { %v917_v63 = vmul.f32 %v3392_v10, %v915_v15 }
0x15d2   :  { %3242 = vmatpush3.bf16.msra.mxu1 %v3689_v20 }
0x15d3   :  { %919 = vrot.lane.b32.xlu0 %v917_v63, %s3488_s0  ;;  %3249 = vmatprep.subr.bf16.mxu1 %v3484_v0 }
0x1645   :  { %v920_v17 = vpop.permute.xlu0 %919 }
0x1646   :  { %v922_v2 = vadd.f32 %v920_v17, %v833_v58  ;;  %v1065_v17 = vadd.f32 %v3673_v54, %v3718_v32 }
0x1648   :  { %3393 = vtanh.f32 %v922_v2 }
0x1652   :  { %v3394_v3 = vpop.eup %3393 }
0x1653   :  { %926 = vrot.lane.b32.xlu0 %v3394_v3, %s3489_s27 }
0x16a0   :  { %v1259_v4 = vpop.f32.mrb[10].mxu1 }
0x16a1   :  { %v1260_v5 = vadd.f32 %v3714_v28, %v1259_v4  ;;  %v3009_v7 = vpop.f32.mrb[11].mxu1 }
0x16a3   :  { %1271 = vrot.lane.b32.xlu1 %v1260_v5, %s3488_s0  ;;  %v1263_v6 = vadd.f32 %v1260_v5, %v1055_v19 }
0x16a5   :  { %v2712_v21 = vmul.f32 -1.442695, %v1263_v6 }
0x16a7   :  { %3395 = vpow2.f32 %v2712_v21 }
0x16b1   :  { %v3396_v22 = vpop.eup %3395 }
0x16b2   :  { %v1267_v23 = vadd.f32 1.0, %v3396_v22 }
0x16b4   :  { %3397 = vrcp.f32 %v1267_v23 }
0x16be   :  { %v3398_v9 = vpop.eup %3397 }
0x16bf   :  { %v1281_v31 = vsub.f32 1.0, %v3398_v9  ;;  %v1287_v34 = vmul.f32 %v3398_v9, %v1187_v49 }
0x16c5   :  { %v927_v12 = vpop.permute.xlu0 %926 }
0x16c6   :  { %v929_v14 = vmul.f32 %v927_v12, %v924_v11 }
0x16c8   :  { %v931_v18 = vadd.f32 %v930_v13, %v929_v14 }
0x16ca   :  { %933 = vrot.lane.b32.xlu0 %v931_v18, %s3489_s27 }
0x1715   :  { %v1272_v25 = vpop.permute.xlu1 %1271 }
0x1716   :  { %v1274_v26 = vmul.f32 %v3398_v9, %v1272_v25 }
0x1718   :  { %1276 = vrot.lane.b32.xlu1 %v1274_v26, %s3488_s0 }
0x173c   :  { %v934_v27 = vpop.permute.xlu0 %933 }
0x173d   :  { %936 = vst.msk [vmem:[#allocation2 + $0x38] sm:$0xff] %vm55_vm1, %v934_v27  ;;  %v1070_v27 = vadd.f32 %v3718_v32, %v3679_v57 }
0x1744   :  { %v954_v24 = vld [vmem:[#allocation2 + $0x38] sm:$0xff] }
0x1745   :  { %2986 = vmatmul.mubr.msk.f32.gmra.mrb[14].mxu0 %vm55_vm1, %v954_v24 }
0x1746   :  { %3018 = vmatprep.mubr.msk.f32.mxu0 %vm3485_vm0, %v3486_v1 }
0x178a   :  { %v1277_v52 = vpop.permute.xlu1 %1276 }
0x178b   :  { %v1279_v29 = vadd.f32 %v1277_v52, %v1055_v19 }
0x178d   :  { %3399 = vtanh.f32 %v1279_v29 }
0x1797   :  { %v3400_v30 = vpop.eup %3399 }
0x1798   :  { %1283 = vrot.lane.b32.xlu1 %v3400_v30, %s3489_s27 }
0x180a   :  { %v1284_v33 = vpop.permute.xlu1 %1283 }
0x180b   :  { %v1286_v35 = vmul.f32 %v1284_v33, %v1281_v31 }
0x180d   :  { %v1288_v36 = vadd.f32 %v1287_v34, %v1286_v35 }
0x180f   :  { %1290 = vrot.lane.b32.xlu1 %v1288_v36, %s3489_s27 }
0x1818   :  { %v3752_v37 = vpop.f32.mrb[14].mxu0 }
0x1819   :  { %v3754_v38 = vpop.f32.mrb[15].mxu0 }
0x1881   :  { %v1291_v39 = vpop.permute.xlu1 %1290 }
0x1882   :  { %3019 = vmatmul.mubr.msk.f32.vlgmr.msra.gmra.mrb[16].mxu0 %vm55_vm1, %v1291_v39 }
0x1883   :  { %3245 = vmatpush3.bf16.msra.mxu0 %v3685_v16  ;;  %3040 = vmatprep.mubr.msk.f32.mxu0 %vm3485_vm0, %v3486_v1 }
0x1884   :  { %3246 = vmatprep.subr.bf16.mxu0 %v3484_v0 }
0x1887   :  { %3248 = vmatpush3.bf16.msra.mxu0 %v3689_v20 }
0x1888   :  { %3255 = vmatprep.subr.bf16.mxu0 %v3484_v0 }
0x1955   :  { %v1360_v40 = vpop.f32.mrb[16].mxu0 }
0x1956   :  { %v1361_v41 = vadd.f32 %v3714_v28, %v1360_v40  ;;  %v3020_v42 = vpop.f32.mrb[17].mxu0 }
0x1958   :  { %1372 = vrot.lane.b32.xlu0 %v1361_v41, %s3488_s0  ;;  %v1364_v44 = vadd.f32 %v1361_v41, %v1060_v43 }
0x195a   :  { %v2714_v45 = vmul.f32 -1.442695, %v1364_v44 }
0x195c   :  { %3401 = vpow2.f32 %v2714_v45 }
0x1966   :  { %v3402_v46 = vpop.eup %3401 }
0x1967   :  { %v1368_v47 = vadd.f32 1.0, %v3402_v46 }
0x1969   :  { %3403 = vrcp.f32 %v1368_v47 }
0x1973   :  { %v3404_v48 = vpop.eup %3403 }
0x1974   :  { %v1382_v59 = vsub.f32 1.0, %v3404_v48  ;;  %v1388_v55 = vmul.f32 %v3404_v48, %v1288_v36 }
0x19ca   :  { %v1373_v49 = vpop.permute.xlu0 %1372 }
0x19cb   :  { %v1375_v50 = vmul.f32 %v3404_v48, %v1373_v49  ;;  %v1075_v48 = vadd.f32 %v3677_v56, %v3718_v32 }
0x19cd   :  { %1377 = vrot.lane.b32.xlu1 %v1375_v50, %s3488_s0 }
0x1a3f   :  { %v1378_v51 = vpop.permute.xlu1 %1377 }
0x1a40   :  { %v1380_v53 = vadd.f32 %v1378_v51, %v1060_v43 }
0x1a42   :  { %3405 = vtanh.f32 %v1380_v53 }
0x1a4c   :  { %v3406_v58 = vpop.eup %3405 }
0x1a4d   :  { %1384 = vrot.lane.b32.xlu0 %v3406_v58, %s3489_s27 }
0x1abf   :  { %v1385_v60 = vpop.permute.xlu0 %1384 }
0x1ac0   :  { %v1387_v8 = vmul.f32 %v1385_v60, %v1382_v59 }
0x1ac2   :  { %v1389_v61 = vadd.f32 %v1388_v55, %v1387_v8 }
0x1ac4   :  { %1391 = vrot.lane.b32.xlu1 %v1389_v61, %s3489_s27 }
0x1b36   :  { %v1392_v62 = vpop.permute.xlu1 %1391 }
0x1b37   :  { %3030 = vmatmul.mubr.msk.f32.vlgmr.msra.gmra.mrb[12].mxu1 %vm55_vm1, %v1392_v62 }
0x1b38   :  { %3251 = vmatpush3.bf16.msra.mxu1 %v3685_v16  ;;  %3051 = vmatprep.mubr.msk.f32.mxu1 %vm3485_vm0, %v3486_v1 }
0x1b39   :  { %3252 = vmatprep.subr.bf16.mxu1 %v3484_v0 }
0x1b3c   :  { %3254 = vmatpush3.bf16.msra.mxu1 %v3689_v20 }
0x1b3d   :  { %3261 = vmatprep.subr.bf16.mxu1 %v3484_v0 }
0x1c0a   :  { %v1461_v10 = vpop.f32.mrb[12].mxu1 }
0x1c0b   :  { %v1462_v15 = vadd.f32 %v3714_v28, %v1461_v10  ;;  %v3031_v63 = vpop.f32.mrb[13].mxu1 }
0x1c0d   :  { %1473 = vrot.lane.b32.xlu0 %v1462_v15, %s3488_s0  ;;  %v1465_v2 = vadd.f32 %v1462_v15, %v1065_v17 }
0x1c0f   :  { %v2716_v3 = vmul.f32 -1.442695, %v1465_v2 }
0x1c11   :  { %3407 = vpow2.f32 %v2716_v3  ;;  %v1080_v3 = vadd.f32 %v3718_v32, %v3754_v38 }
0x1c1b   :  { %v3408_v4 = vpop.eup %3407 }
0x1c1c   :  { %v1469_v5 = vadd.f32 1.0, %v3408_v4 }
0x1c1e   :  { %3409 = vrcp.f32 %v1469_v5 }
0x1c28   :  { %v3410_v7 = vpop.eup %3409 }
0x1c29   :  { %v1483_v19 = vsub.f32 1.0, %v3410_v7  ;;  %v1489_v54 = vmul.f32 %v3410_v7, %v1389_v61 }
0x1c7f   :  { %v1474_v11 = vpop.permute.xlu0 %1473 }
0x1c80   :  { %v1476_v12 = vmul.f32 %v3410_v7, %v1474_v11 }
0x1c82   :  { %1478 = vrot.lane.b32.xlu1 %v1476_v12, %s3488_s0 }
0x1cf4   :  { %v1479_v13 = vpop.permute.xlu1 %1478 }
0x1cf5   :  { %v1481_v14 = vadd.f32 %v1479_v13, %v1065_v17 }
0x1cf7   :  { %3411 = vtanh.f32 %v1481_v14 }
0x1d01   :  { %v3412_v18 = vpop.eup %3411 }
0x1d02   :  { %1485 = vrot.lane.b32.xlu0 %v3412_v18, %s3489_s27 }
0x1d74   :  { %v1486_v6 = vpop.permute.xlu0 %1485 }
0x1d75   :  { %v1488_v21 = vmul.f32 %v1486_v6, %v1483_v19 }
0x1d77   :  { %v1490_v22 = vadd.f32 %v1489_v54, %v1488_v21 }
0x1d79   :  { %1492 = vrot.lane.b32.xlu1 %v1490_v22, %s3489_s27 }
0x1deb   :  { %v1493_v23 = vpop.permute.xlu1 %1492 }
0x1dec   :  { %3041 = vmatmul.mubr.msk.f32.vlgmr.msra.gmra.mrb[18].mxu0 %vm55_vm1, %v1493_v23 }
0x1ded   :  { %3257 = vmatpush3.bf16.msra.mxu0 %v3685_v16  ;;  %3062 = vmatprep.mubr.msk.f32.mxu0 %vm3485_vm0, %v3486_v1 }
0x1dee   :  { %3258 = vmatprep.subr.bf16.mxu0 %v3484_v0 }
0x1df1   :  { %3260 = vmatpush3.bf16.msra.mxu0 %v3689_v20 }
0x1df2   :  { %3267 = vmatprep.subr.bf16.mxu0 %v3484_v0 }
0x1ebf   :  { %v1562_v9 = vpop.f32.mrb[18].mxu0 }
0x1ec0   :  { %v1563_v25 = vadd.f32 %v3714_v28, %v1562_v9  ;;  %v3042_v26 = vpop.f32.mrb[19].mxu0 }
0x1ec2   :  { %1574 = vrot.lane.b32.xlu0 %v1563_v25, %s3488_s0  ;;  %v1566_v24 = vadd.f32 %v1563_v25, %v1070_v27 }
0x1ec4   :  { %v2718_v52 = vmul.f32 -1.442695, %v1566_v24  ;;  %v1085_v24 = vadd.f32 %v3752_v37, %v3718_v32 }
0x1ec6   :  { %3413 = vpow2.f32 %v2718_v52 }
0x1ed0   :  { %v3414_v29 = vpop.eup %3413 }
0x1ed1   :  { %v1570_v30 = vadd.f32 1.0, %v3414_v29 }
0x1ed3   :  { %3415 = vrcp.f32 %v1570_v30 }
0x1edd   :  { %v3416_v31 = vpop.eup %3415 }
0x1ede   :  { %v1584_v40 = vsub.f32 1.0, %v3416_v31  ;;  %v1590_v57 = vmul.f32 %v3416_v31, %v1490_v22 }
0x1f34   :  { %v1575_v33 = vpop.permute.xlu0 %1574 }
0x1f35   :  { %v1577_v34 = vmul.f32 %v3416_v31, %v1575_v33 }
0x1f37   :  { %1579 = vrot.lane.b32.xlu1 %v1577_v34, %s3488_s0 }
0x1fa9   :  { %v1580_v35 = vpop.permute.xlu1 %1579 }
0x1faa   :  { %v1582_v36 = vadd.f32 %v1580_v35, %v1070_v27 }
0x1fac   :  { %3417 = vtanh.f32 %v1582_v36 }
0x1fb6   :  { %v3418_v39 = vpop.eup %3417 }
0x1fb7   :  { %1586 = vrot.lane.b32.xlu0 %v3418_v39, %s3489_s27 }
0x2029   :  { %v1587_v41 = vpop.permute.xlu0 %1586 }
0x202a   :  { %v1589_v42 = vmul.f32 %v1587_v41, %v1584_v40  ;;  %v1896_v40 = vld [vmem:[#allocation3 + $0x90] sm:$0xff]  ;;  %v1897_v41 = vld [vmem:[#allocation3 + $0x98] sm:$0xff] }
0x202c   :  { %v1591_v43 = vadd.f32 %v1590_v57, %v1589_v42  ;;  %v1898_v42 = vld [vmem:[#allocation3 + $0xa0] sm:$0xff] }
0x202d   :  { %v3271_v32 = vpack.c.bf16 %v1898_v42, %v1897_v41 }
0x202e   :  { %1593 = vrot.lane.b32.xlu1 %v1591_v43, %s3489_s27 }
0x20a0   :  { %v1594_v44 = vpop.permute.xlu1 %1593 }
0x20a1   :  { %3052 = vmatmul.mubr.msk.f32.vlgmr.msra.gmra.mrb[14].mxu1 %vm55_vm1, %v1594_v44 }
0x20a2   :  { %3263 = vmatpush3.bf16.msra.mxu1 %v3685_v16  ;;  %3073 = vmatprep.mubr.msk.f32.mxu1 %vm3485_vm0, %v3486_v1 }
0x20a3   :  { %3264 = vmatprep.subr.bf16.mxu1 %v3484_v0 }
0x20a6   :  { %3266 = vmatpush3.bf16.msra.mxu1 %v3689_v20 }
0x20a7   :  { %3273 = vmatprep.subr.bf16.mxu1 %v3484_v0 }
0x2174   :  { %v1663_v45 = vpop.f32.mrb[14].mxu1 }
0x2175   :  { %v1664_v46 = vadd.f32 %v3714_v28, %v1663_v45  ;;  %v3053_v47 = vpop.f32.mrb[15].mxu1 }
0x2177   :  { %1675 = vrot.lane.b32.xlu0 %v1664_v46, %s3488_s0  ;;  %v1667_v49 = vadd.f32 %v1664_v46, %v1075_v48 }
0x2179   :  { %v2720_v16 = vmul.f32 -1.442695, %v1667_v49  ;;  %v2725_v49 = vld [vmem:[#allocation3 + $0xa8] ss:$0 sm:$0xff] }
0x217b   :  { %3419 = vpow2.f32 %v2720_v16 }
0x2185   :  { %v3420_v50 = vpop.eup %3419 }
0x2186   :  { %v1671_v51 = vadd.f32 1.0, %v3420_v50 }
0x2188   :  { %3421 = vrcp.f32 %v1671_v51 }
0x2192   :  { %v3422_v53 = vpop.eup %3421 }
0x2193   :  { %v1685_v8 = vsub.f32 1.0, %v3422_v53  ;;  %v1691_v56 = vmul.f32 %v3422_v53, %v1591_v43 }
0x21e9   :  { %v1676_v58 = vpop.permute.xlu0 %1675 }
0x21ea   :  { %v1678_v20 = vmul.f32 %v3422_v53, %v1676_v58 }
0x21ec   :  { %1680 = vrot.lane.b32.xlu1 %v1678_v20, %s3488_s0 }
0x225e   :  { %v1681_v59 = vpop.permute.xlu1 %1680 }
0x225f   :  { %v1683_v60 = vadd.f32 %v1681_v59, %v1075_v48 }
0x2261   :  { %3423 = vtanh.f32 %v1683_v60 }
0x226b   :  { %v3424_v55 = vpop.eup %3423 }
0x226c   :  { %1687 = vrot.lane.b32.xlu0 %v3424_v55, %s3489_s27 }
0x22de   :  { %v1688_v61 = vpop.permute.xlu0 %1687 }
0x22df   :  { %v1690_v62 = vmul.f32 %v1688_v61, %v1685_v8  ;;  %v2006_v8 = vld [vmem:[#allocation3 + $0xc0] sm:$0xff]  ;;  %v2007_v61 = vld [vmem:[#allocation3 + $0xc8] sm:$0xff] }
0x22e1   :  { %v1692_v10 = vadd.f32 %v1691_v56, %v1690_v62  ;;  %v3274_v56 = vpack.c.bf16 %v2007_v61, %v2006_v8  ;;  %v2008_v62 = vld [vmem:[#allocation3 + $0xd0] sm:$0xff] }
0x22e3   :  { %1694 = vrot.lane.b32.xlu1 %v1692_v10, %s3489_s27 }
0x2355   :  { %v1695_v15 = vpop.permute.xlu1 %1694 }
0x2356   :  { %3063 = vmatmul.mubr.msk.f32.vlgmr.msra.gmra.mrb[20].mxu0 %vm55_vm1, %v1695_v15 }
0x2357   :  { %3084 = vmatprep.mubr.msk.f32.mxu0 %vm3485_vm0, %v3486_v1 }
0x2429   :  { %v1764_v63 = vpop.f32.mrb[20].mxu0 }
0x242a   :  { %v1765_v17 = vadd.f32 %v3714_v28, %v1764_v63  ;;  %v3064_v2 = vpop.f32.mrb[21].mxu0 }
0x242c   :  { %1776 = vrot.lane.b32.xlu0 %v1765_v17, %s3488_s0  ;;  %v1768_v4 = vadd.f32 %v1765_v17, %v1080_v3 }
0x242e   :  { %v2722_v5 = vmul.f32 -1.442695, %v1768_v4  ;;  %v2727_v4 = vld [vmem:[#allocation3 + $0xb0] ss:$0 sm:$0xff] }
0x2430   :  { %3425 = vpow2.f32 %v2722_v5 }
0x243a   :  { %v3426_v7 = vpop.eup %3425 }
0x243b   :  { %v1772_v11 = vadd.f32 1.0, %v3426_v7  ;;  %v2728_v7 = vld [vmem:[#allocation3 + $0xb8] ss:$0 sm:$0xff] }
0x243d   :  { %3427 = vrcp.f32 %v1772_v11 }
0x2447   :  { %v3428_v12 = vpop.eup %3427 }
0x2448   :  { %v1786_v54 = vsub.f32 1.0, %v3428_v12  ;;  %v1792_v38 = vmul.f32 %v3428_v12, %v1692_v10  ;;  %v2009_v10 = vld [vmem:[#allocation3 + $0xd8] sm:$0xff] }
0x2449   :  { %v3277_v15 = vpack.c.bf16 %v2009_v10, %v2008_v62 }
0x249e   :  { %v1777_v13 = vpop.permute.xlu0 %1776 }
0x249f   :  { %v1779_v14 = vmul.f32 %v3428_v12, %v1777_v13 }
0x24a1   :  { %1781 = vrot.lane.b32.xlu1 %v1779_v14, %s3488_s0  ;;  %v2729_v14 = vld [vmem:[#allocation3 + $0xe0] ss:$0 sm:$0xff] }
0x2513   :  { %v1782_v18 = vpop.permute.xlu1 %1781 }
0x2514   :  { %v1784_v19 = vadd.f32 %v1782_v18, %v1080_v3 }
0x2516   :  { %3429 = vtanh.f32 %v1784_v19 }
0x2520   :  { %v3430_v6 = vpop.eup %3429 }
0x2521   :  { %1788 = vrot.lane.b32.xlu0 %v3430_v6, %s3489_s27 }
0x2593   :  { %v1789_v21 = vpop.permute.xlu0 %1788 }
0x2594   :  { %v1791_v22 = vmul.f32 %v1789_v21, %v1786_v54 }
0x2596   :  { %v1793_v23 = vadd.f32 %v1792_v38, %v1791_v22 }
0x2598   :  { %1795 = vrot.lane.b32.xlu1 %v1793_v23, %s3489_s27 }
0x260a   :  { %v1796_v9 = vpop.permute.xlu1 %1795 }
0x260b   :  { %3074 = vmatmul.mubr.msk.f32.vlgmr.msra.gmra.mrb[16].mxu1 %vm55_vm1, %v1796_v9 }
0x260c   :  { %3095 = vmatprep.mubr.msk.f32.mxu1 %vm3485_vm0, %v3486_v1  ;;  %3275 = vmatpush3.bf16.msra.mxu1 %v3274_v56 }
0x260d   :  { %3276 = vmatprep.subr.bf16.mxu1 %v3484_v0 }
0x2610   :  { %3278 = vmatpush3.bf16.msra.mxu1 %v3277_v15 }
0x2611   :  { %3109 = vmatprep.subr.mxu1 %v3486_v1 }
0x26de   :  { %v1865_v25 = vpop.f32.mrb[16].mxu1 }
0x26df   :  { %v1866_v26 = vadd.f32 %v3714_v28, %v1865_v25  ;;  %v3075_v27 = vpop.f32.mrb[17].mxu1  ;;  %v1895_v28 = vld [vmem:[#allocation3 + $0x88] sm:$0xff]  ;;  %v2114_v25 = vld [vmem:[#allocation3 + $0xf8] sm:$0xff] }
0x26e0   :  { %v3268_v57 = vpack.c.bf16 %v1896_v40, %v1895_v28 }
0x26e1   :  { %1877 = vrot.lane.b32.xlu0 %v1866_v26, %s3488_s0  ;;  %v1869_v52 = vadd.f32 %v1866_v26, %v1085_v24  ;;  %v2115_v26 = vld [vmem:[#allocation3 + $0x100] sm:$0xff] }
0x26e2   :  { %3269 = vmatpush3.bf16.msra.mxu0 %v3268_v57  ;;  %v3280_v27 = vpack.c.bf16 %v2115_v26, %v2114_v25  ;;  %v3857_v57 = vld [vmem:[%s3906_s1] sm:$0xff] }
0x26e3   :  { %v2724_v29 = vmul.f32 -1.442695, %v1869_v52  ;;  %3270 = vmatprep.subr.bf16.mxu0 %v3484_v0  ;;  %v2117_v52 = vld [vmem:[#allocation3 + $0x110] sm:$0xff]  ;;  %v2197_v42 = vadd.f32 1e-10, %v3857_v57 }
0x26e5   :  { %3431 = vpow2.f32 %v2724_v29 }
0x26e6   :  { %3272 = vmatpush3.bf16.msra.mxu0 %v3271_v32 }
0x26e7   :  { %3279 = vmatprep.subr.bf16.mxu0 %v3484_v0 }
0x26ef   :  { %v3432_v30 = vpop.eup %3431 }
0x26f0   :  { %v1873_v31 = vadd.f32 1.0, %v3432_v30 }
0x26f2   :  { %3433 = vrcp.f32 %v1873_v31 }
0x26fc   :  { %v3434_v33 = vpop.eup %3433 }
0x26fd   :  { %v1887_v43 = vsub.f32 1.0, %v3434_v33  ;;  %v1893_v45 = vmul.f32 %v3434_v33, %v1793_v23 }
0x2753   :  { %v1878_v34 = vpop.permute.xlu0 %1877 }
0x2754   :  { %v1880_v35 = vmul.f32 %v3434_v33, %v1878_v34 }
0x2756   :  { %1882 = vrot.lane.b32.xlu1 %v1880_v35, %s3488_s0  ;;  %v2731_v35 = vld [vmem:[#allocation3 + $0xe8] ss:$0 sm:$0xff] }
0x27c8   :  { %v1883_v36 = vpop.permute.xlu1 %1882 }
0x27c9   :  { %v1885_v39 = vadd.f32 %v1883_v36, %v1085_v24  ;;  %v2116_v24 = vld [vmem:[#allocation3 + $0x108] sm:$0xff] }
0x27ca   :  { %v3283_v29 = vpack.c.bf16 %v2117_v52, %v2116_v24 }
0x27cb   :  { %3435 = vtanh.f32 %v1885_v39  ;;  %v2732_v39 = vld [vmem:[#allocation3 + $0xf0] ss:$0 sm:$0xff] }
0x27d5   :  { %v3436_v37 = vpop.eup %3435 }
0x27d6   :  { %1889 = vrot.lane.b32.xlu0 %v3436_v37, %s3489_s27 }
0x2848   :  { %v1890_v44 = vpop.permute.xlu0 %1889 }
0x2849   :  { %v1892_v46 = vmul.f32 %v1890_v44, %v1887_v43 }
0x284b   :  { %v1894_v47 = vadd.f32 %v1893_v45, %v1892_v46 }
0x284d   :  { %1905 = vrot.lane.b32.xlu1 %v1894_v47, %s3489_s27  ;;  %v2733_v47 = vld [vmem:[#allocation3 + $0x118] ss:$0 sm:$0xff] }
0x28bf   :  { %v3834_v48 = vpop.permute.xlu1 %1905 }
0x28c0   :  { %3085 = vmatmul.mubr.msk.f32.vlgmr.msra.gmra.mrb[22].mxu0 %vm55_vm1, %v3834_v48 }
0x28c1   :  { %3106 = vmatprep.mubr.msk.f32.mxu0 %vm3485_vm0, %v3486_v1  ;;  %3281 = vmatpush3.bf16.msra.mxu0 %v3280_v27 }
0x28c2   :  { %3282 = vmatprep.subr.bf16.mxu0 %v3484_v0 }
0x28c5   :  { %3284 = vmatpush3.bf16.msra.mxu0 %v3283_v29 }
0x28c6   :  { %3291 = vmatprep.subr.bf16.mxu0 %v3484_v0 }
0x2993   :  { %v1975_v16 = vpop.f32.mrb[22].mxu0 }
0x2994   :  { %v1976_v50 = vadd.f32 %v2725_v49, %v1975_v16  ;;  %v3086_v51 = vpop.f32.mrb[23].mxu0 }
0x2996   :  { %v1981_v53 = vsel %vm55_vm1, %v1976_v50, 0.0 }
0x2997   :  { %1982 = vadd.xlane.f32.xlu0 %v1981_v53 }
0x2a24   :  { %v1983_v58 = vpop.xlane.xlu0 %1982 }
0x2a25   :  { %v1985_v20 = vmul.f32 0.03125, %v1983_v58 }
0x2a27   :  { %v1986_v59 = vsub.f32 %v1976_v50, %v1985_v20  ;;  %v2206_v20 = vlaneseq }
0x2a29   :  { %v1987_v60 = vmul.f32 %v1986_v59, %v1986_v59 }
0x2a2b   :  { %v1988_v55 = vsel %vm55_vm1, %v1987_v60, 0.0 }
0x2a2c   :  { %1989 = vadd.xlane.f32.xlu1 %v1988_v55 }
0x2ab9   :  { %v1990_v63 = vpop.xlane.xlu1 %1989 }
0x2aba   :  { %v1991_v17 = vmul.f32 0.03125, %v1990_v63 }
0x2abc   :  { %v1992_v2 = vadd.f32 1e-05, %v1991_v17  ;;  %v2236_v17 = vld [vmem:[#allocation3 + $0x140] sm:$0xff] }
0x2abe   :  { %3437 = vrsqrt.f32 %v1992_v2 }
0x2ac8   :  { %v3438_v3 = vpop.eup %3437 }
0x2ac9   :  { %v1994_v5 = vmul.f32 %v3438_v3, %v1986_v59  ;;  %v2207_v59 = vand.u32 127, %v2206_v20 }
0x2acb   :  { %v1999_v11 = vmul.f32 %v2727_v4, %v1994_v5 }
0x2acd   :  { %v2004_v12 = vadd.f32 %v2728_v7, %v1999_v11  ;;  %v2232_v7 = vld [vmem:[#allocation3 + $0x120] sm:$0xff]  ;;  %v2233_v11 = vld [vmem:[#allocation3 + $0x128] sm:$0xff] }
0x2acf   :  { %v2005_v13 = vmax.f32 %v2004_v12, 0.0 }
0x2ad1   :  { %3096 = vmatmul.mubr.msk.f32.vlgmr.msra.gmra.mrb[18].mxu1 %vm55_vm1, %v2005_v13  ;;  %v3286_v13 = vpack.c.bf16 %v2233_v11, %v2232_v7 }
0x2ad2   :  { %3111 = vmatprep.mubr.msk.f32.mxu1 %vm3485_vm0, %v3486_v1  ;;  %3110 = vmatpush3.msra.mxu1 %v2236_v17  ;;  %v2741_v17 = vld [vmem:[#allocation3 + $0x1a0] ss:$0 sm:$0xff] }
0x2ad3   :  { %3285 = vmatprep.subr.bf16.mxu1 %v3484_v0 }
0x2ba4   :  { %v2084_v18 = vpop.f32.mrb[18].mxu1 }
0x2ba5   :  { %v2085_v19 = vadd.f32 %v2729_v14, %v2084_v18  ;;  %v3097_v6 = vpop.f32.mrb[19].mxu1  ;;  %v2234_v14 = vld [vmem:[#allocation3 + $0x130] sm:$0xff]  ;;  %v2235_v18 = vld [vmem:[#allocation3 + $0x138] sm:$0xff] }
0x2ba6   :  { %v3289_v6 = vpack.c.bf16 %v2235_v18, %v2234_v14 }
0x2ba7   :  { %v2090_v54 = vsel %vm55_vm1, %v2085_v19, 0.0 }
0x2ba8   :  { %2091 = vadd.xlane.f32.xlu0 %v2090_v54 }
0x2c35   :  { %v2092_v21 = vpop.xlane.xlu0 %2091 }
0x2c36   :  { %v2093_v38 = vmul.f32 0.03125, %v2092_v21 }
0x2c38   :  { %v2094_v22 = vsub.f32 %v2085_v19, %v2093_v38 }
0x2c3a   :  { %v2095_v23 = vmul.f32 %v2094_v22, %v2094_v22 }
0x2c3c   :  { %v2096_v9 = vsel %vm55_vm1, %v2095_v23, 0.0 }
0x2c3d   :  { %2097 = vadd.xlane.f32.xlu0 %v2096_v9 }
0x2cca   :  { %v2098_v30 = vpop.xlane.xlu0 %2097 }
0x2ccb   :  { %v2099_v31 = vmul.f32 0.03125, %v2098_v30 }
0x2ccd   :  { %v2100_v33 = vadd.f32 1e-05, %v2099_v31 }
0x2ccf   :  { %3439 = vrsqrt.f32 %v2100_v33 }
0x2cd0   :  { %3441 = vlog2.f32 %v2197_v42  ;;  %v2436_v42 = vld [vmem:[#allocation3 + $0x170] sm:$0xff] }
0x2cd9   :  { %v3440_v34 = vpop.eup %3439 }
0x2cda   :  { %v2102_v36 = vmul.f32 %v3440_v34, %v2094_v22  ;;  %v3442_v32 = vpop.eup %3441  ;;  %v2738_v22 = vld [vmem:[#allocation3 + $0x148] ss:$0 sm:$0xff] }
0x2cdb   :  { %v2199_v37 = vmul.f32 0.6931472, %v3442_v32  ;;  %v2437_v32 = vld [vmem:[#allocation3 + $0x178] sm:$0xff] }
0x2cdc   :  { %v2107_v28 = vmul.f32 %v2731_v35, %v2102_v36 }
0x2cdd   :  { %v2200_v43 = vsub.f32 0.0, %v2199_v37  ;;  %v3295_v37 = vpack.c.bf16 %v2437_v32, %v2436_v42 }
0x2cde   :  { %v2112_v40 = vadd.f32 %v2732_v39, %v2107_v28  ;;  %v2434_v28 = vld [vmem:[#allocation3 + $0x160] sm:$0xff] }
0x2cdf   :  { %v2201_v44 = vadd.f32 1e-10, %v2200_v43  ;;  %v2438_v43 = vld [vmem:[#allocation3 + $0x180] sm:$0xff] }
0x2ce0   :  { %v2113_v41 = vmax.f32 %v2112_v40, 0.0  ;;  %v2435_v40 = vld [vmem:[#allocation3 + $0x168] sm:$0xff] }
0x2ce1   :  { %3443 = vlog2.f32 %v2201_v44  ;;  %v2439_v44 = vld [vmem:[#allocation3 + $0x188] sm:$0xff] }
0x2ce2   :  { %3107 = vmatmul.mubr.msk.f32.vlgmr.msra.gmra.mrb[24].mxu0 %vm55_vm1, %v2113_v41  ;;  %v3292_v41 = vpack.c.bf16 %v2435_v40, %v2434_v28 }
0x2ce3   :  { %3141 = vmatprep.mubr.msk.f32.mxu0 %vm3485_vm0, %v3486_v1 }
0x2ce4   :  { %3293 = vmatpush3.bf16.msra.mxu0 %v3292_v41 }
0x2ce5   :  { %3294 = vmatprep.subr.bf16.mxu0 %v3484_v0 }
0x2ce8   :  { %3296 = vmatpush3.bf16.msra.mxu0 %v3295_v37 }
0x2ce9   :  { %3297 = vmatprep.subr.bf16.mxu0 %v3484_v0 }
0x2ceb   :  { %v3444_v45 = vpop.eup %3443 }
0x2cec   :  { %v2203_v46 = vmul.f32 0.6931472, %v3444_v45  ;;  %v3298_v45 = vpack.c.bf16 %v2439_v44, %v2438_v43 }
0x2cee   :  { %v2204_v49 = vsub.f32 0.0, %v2203_v46  ;;  %v2440_v46 = vld [vmem:[#allocation3 + $0x190] sm:$0xff]  ;;  %3299 = vmatpush3.bf16.msra.mxu0 %v3298_v45  ;;  %v2743_v45 = vld [vmem:[#allocation3 + $0x1a8] ss:$0 sm:$0xff] }
0x2cef   :  { %3300 = vmatprep.subr.bf16.mxu0 %v3484_v0 }
0x2db5   :  { %v2192_v16 = vpop.f32.mrb[24].mxu0 }
0x2db6   :  { %v2193_v50 = vadd.f32 %v2733_v47, %v2192_v16  ;;  %v3108_v51 = vpop.f32.mrb[25].mxu0  ;;  %v2441_v47 = vld [vmem:[#allocation3 + $0x198] sm:$0xff] }
0x2db8   :  { %v2205_v53 = vadd.f32 %v2204_v49, %v2193_v50  ;;  %v3301_v49 = vpack.c.bf16 %v2441_v47, %v2440_v46  ;;  %v2744_v46 = vld [vmem:[#allocation3 + $0x1b0] ss:$0 sm:$0xff] }
0x2dba   :  { %v2209_v58 = vsel %vm2208_vm2, %v2205_v53, -inf  ;;  %3302 = vmatpush3.bf16.msra.mxu0 %v3301_v49 }
0x2dbb   :  { %2210 = vmax.xlane.f32.xlu1 %v2209_v58 }
0x2e48   :  { %v2211_v60 = vpop.xlane.xlu1 %2210 }
0x2e49   :  { %vm2212_vm3 = vcmp.eq.f32.partialorder %v2205_v53, %v2211_v60 }
0x2e4a   :  { %v2213_v55 = vsel %vm2212_vm3, %v2207_v59, 8 }
0x2e4b   :  { %v2214_v8 = vsel %vm2208_vm2, %v2213_v55, 2147483647 }
0x2e4c   :  { %v2216_v61 = vshra.s32 %v2214_v8, 16  ;;  %v2215_v62 = vand.u32 65535, %v2214_v8 }
0x2e4e   :  { %v2218_v56 = vcvt.s32.f32 %v2216_v61  ;;  %v2217_v15 = vcvt.s32.f32 %v2215_v62  ;;  %v2739_v61 = vld [vmem:[#allocation3 + $0x150] ss:$0 sm:$0xff] }
0x2e50   :  { %2219 = vmin.xlane.f32.xlu0 %v2218_v56 }
0x2edd   :  { %v2220_v10 = vpop.xlane.xlu0 %2219 }
0x2ede   :  { %vm2221_vm4 = vcmp.eq.f32.partialorder %v2218_v56, %v2220_v10  ;;  %v2226_v2 = vcvt.f32.s32 %v2220_v10  ;;  %v2740_v56 = vld [vmem:[#allocation3 + $0x158] ss:$0 sm:$0xff] }
0x2edf   :  { %v2222_v63 = vsel %vm2221_vm4, %v2217_v15, inf }
0x2ee0   :  { %2223 = vmin.xlane.f32.xlu1 %v2222_v63  ;;  %v2227_v4 = vshll.u32 %v2226_v2, 16 }
0x2f6d   :  { %v2224_v3 = vpop.xlane.xlu1 %2223 }
0x2f6e   :  { %v2225_v5 = vcvt.f32.s32 %v2224_v3 }
0x2f70   :  { %v2228_v12 = vadd.s32 %v2227_v4, %v2225_v5 }
0x2f72   :  { %vm2229_vm5 = vcmp.eq.s32.totalorder %v2207_v59, %v2228_v12 }
0x2f73   :  { %v3864_v19 = vsel %vm2229_vm5, 1.0, %v3486_v1 }
0x2f74   :  { %3112 = vmatmul.mubr.msk.f32.vlgmr.msra.gmra.mrb[20].mxu1 %vm2208_vm2, %v3864_v19 }
0x2f75   :  { %3287 = vmatpush3.bf16.msra.mxu1 %v3286_v13  ;;  %3122 = vmatprep.mubr.msk.f32.mxu1 %vm3485_vm0, %v3486_v1 }
0x2f76   :  { %3288 = vmatprep.subr.bf16.mxu1 %v3484_v0 }
0x2f79   :  { %3290 = vmatpush3.bf16.msra.mxu1 %v3289_v6 }
0x2f7a   :  { %3303 = vmatprep.subr.bf16.mxu1 %v3484_v0 }
0x2f7c   :  { %3123 = vmatmul.mubr.msk.f32.vlgmr.msra.gmra.mrb[22].mxu1 %vm55_vm1, %v3834_v48 }
0x2f7d   :  { %3160 = vmatprep.mubr.msk.f32.mxu1 %vm3485_vm0, %v3486_v1 }
0x3047   :  { %v2306_v54 = vpop.f32.mrb[20].mxu1 }
0x3048   :  { %v3113_v21 = vpop.f32.mrb[21].mxu1 }
0x304f   :  { %v2376_v38 = vpop.f32.mrb[22].mxu1 }
0x3050   :  { %v2377_v23 = vadd.f32 %v2376_v38, %v2306_v54  ;;  %v3124_v9 = vpop.f32.mrb[23].mxu1 }
0x3052   :  { %v2385_v25 = vadd.f32 %v2738_v22, %v2377_v23 }
0x3054   :  { %2402 = vrot.lane.b32.xlu0 %v2385_v25, %s3489_s27  ;;  %v2388_v24 = vsel %vm55_vm1, %v2385_v25, 0.0 }
0x30c6   :  { %v2403_v26 = vpop.permute.xlu0 %2402 }
0x30c7   :  { %v2405_v27 = vsel %vm55_vm1, %v2403_v26, 0.0  ;;  %v2570_v26 = vld [vmem:[#allocation3 + $0x1c0] sm:$0xff] }
0x30c8   :  { %2406 = vadd.xlane.f32.xlu1 %v2405_v27 }
0x30cc   :  { %2389 = vadd.xlane.f32.xlu1 %v2388_v24  ;;  %v2571_v24 = vld [vmem:[#allocation3 + $0x1c8] sm:$0xff] }
0x3155   :  { %v2407_v48 = vpop.xlane.xlu1 %2406 }
0x3156   :  { %v2408_v52 = vmul.f32 0.03125, %v2407_v48  ;;  %v2572_v48 = vld [vmem:[#allocation3 + $0x1d0] sm:$0xff] }
0x3158   :  { %v2409_v29 = vsub.f32 %v2385_v25, %v2408_v52  ;;  %v3307_v52 = vpack.c.bf16 %v2572_v48, %v2571_v24 }
0x3159   :  { %v2390_v1 = vpop.xlane.xlu1 %2389 }
0x315a   :  { %v2391_v30 = vmul.f32 0.03125, %v2390_v1  ;;  %v2410_v31 = vmul.f32 %v2409_v29, %v2409_v29  ;;  %v2574_v1 = vld [vmem:[#allocation3 + $0x1e0] sm:$0xff] }
0x315c   :  { %v2392_v33 = vsub.f32 %v2385_v25, %v2391_v30  ;;  %2412 = vrot.lane.b32.xlu1 %v2410_v31, %s3489_s27  ;;  %v2569_v25 = vld [vmem:[#allocation3 + $0x1b8] sm:$0xff]  ;;  %v2575_v31 = vld [vmem:[#allocation3 + $0x1e8] sm:$0xff] }
0x315d   :  { %v3304_v27 = vpack.c.bf16 %v2570_v26, %v2569_v25 }
0x315e   :  { %v2393_v34 = vmul.f32 %v2392_v33, %v2392_v33 }
0x315f   :  { %3305 = vmatpush3.bf16.msra.mxu1 %v3304_v27 }
0x3160   :  { %v2394_v35 = vsel %vm55_vm1, %v2393_v34, 0.0  ;;  %3306 = vmatprep.subr.bf16.mxu1 %v3484_v0 }
0x3161   :  { %2395 = vadd.xlane.f32.xlu0 %v2394_v35  ;;  %v3497_v35 = vmov 8  }
0x3162   :  { %3340 = vset.pattern.permute.xlu0 %v3497_v35 }
0x3163   :  { %3308 = vmatpush3.bf16.msra.mxu1 %v3307_v52 }
0x3164   :  { %3309 = vmatprep.subr.bf16.mxu1 %v3484_v0 }
0x31ce   :  { %v2413_v36 = vpop.permute.xlu1 %2412 }
0x31cf   :  { %v2415_v39 = vsel %vm55_vm1, %v2413_v36, 0.0 }
0x31d0   :  { %2416 = vadd.xlane.f32.xlu1 %v2415_v39 }
0x31ee   :  { %v2396_v16 = vpop.xlane.xlu0 %2395 }
0x31ef   :  { %v2397_v50 = vmul.f32 0.03125, %v2396_v16 }
0x31f1   :  { %v2398_v51 = vadd.f32 1e-05, %v2397_v50 }
0x31f3   :  { %3445 = vrsqrt.f32 %v2398_v51 }
0x31fd   :  { %v3446_v59 = vpop.eup %3445 }
0x31fe   :  { %v2400_v55 = vmul.f32 %v3446_v59, %v2392_v33  ;;  %v2576_v33 = vld [vmem:[#allocation3 + $0x1f0] sm:$0xff] }
0x31ff   :  { %v3313_v34 = vpack.c.bf16 %v2576_v33, %v2575_v31 }
0x325d   :  { %v2417_v53 = vpop.xlane.xlu1 %2416 }
0x325e   :  { %v2418_v58 = vmul.f32 0.03125, %v2417_v53 }
0x3260   :  { %v2419_v20 = vadd.f32 1e-05, %v2418_v58 }
0x3262   :  { %3447 = vrsqrt.f32 %v2419_v20 }
0x326c   :  { %v3448_v60 = vpop.eup %3447 }
0x326d   :  { %v2421_v8 = vmul.f32 %v3448_v60, %v2409_v29  ;;  %v2573_v29 = vld [vmem:[#allocation3 + $0x1d8] sm:$0xff] }
0x326e   :  { %v3310_v30 = vpack.c.bf16 %v2574_v1, %v2573_v29 }
0x326f   :  { %v2422_v62 = vsel %vm55_vm1, %v2400_v55, %v2421_v8 }
0x3270   :  { %v2427_v10 = vmul.f32 %v2739_v61, %v2422_v62  ;;  %3311 = vmatpush3.bf16.msra.mxu1 %v3310_v30 }
0x3271   :  { %3312 = vmatprep.subr.bf16.mxu1 %v3484_v0 }
0x3272   :  { %v2432_v15 = vadd.f32 %v2740_v56, %v2427_v10 }
0x3274   :  { %v2433_v63 = vmax.f32 %v2432_v15, 0.0  ;;  %3314 = vmatpush3.bf16.msra.mxu1 %v3313_v34 }
0x3276   :  { %3142 = vmatmul.mubr.msk.f32.vlgmr.msra.gmra.mrb[26].mxu0 %vm2447_vm6, %v2433_v63 }
0x3349   :  { %v2517_v2 = vpop.f32.mrb[26].mxu0 }
0x334a   :  { %v2518_v3 = vadd.f32 %v2741_v17, %v2517_v2  ;;  %v3143_v4 = vpop.f32.mrb[27].mxu0 }
0x334c   :  { %2537 = vrot.lane.b32.xlu0 %v2518_v3, %s3489_s27  ;;  %v2523_v11 = vsel %vm55_vm1, %v2518_v3, 0.0 }
0x33be   :  { %v2538_v5 = vpop.permute.xlu0 %2537 }
0x33bf   :  { %v2540_v7 = vsel %vm55_vm1, %v2538_v5, 0.0 }
0x33c0   :  { %2541 = vadd.xlane.f32.xlu1 %v2540_v7 }
0x33c4   :  { %2524 = vadd.xlane.f32.xlu1 %v2523_v11 }
0x344d   :  { %v2542_v12 = vpop.xlane.xlu1 %2541 }
0x344e   :  { %v2543_v13 = vmul.f32 0.03125, %v2542_v12 }
0x3450   :  { %v2544_v14 = vsub.f32 %v2518_v3, %v2543_v13 }
0x3451   :  { %v2525_v18 = vpop.xlane.xlu1 %2524 }
0x3452   :  { %v2526_v6 = vmul.f32 0.03125, %v2525_v18  ;;  %v2545_v54 = vmul.f32 %v2544_v14, %v2544_v14 }
0x3454   :  { %v2527_v21 = vsub.f32 %v2518_v3, %v2526_v6  ;;  %2547 = vrot.lane.b32.xlu1 %v2545_v54, %s3489_s27 }
0x3456   :  { %v2528_v38 = vmul.f32 %v2527_v21, %v2527_v21 }
0x3458   :  { %v2529_v22 = vsel %vm55_vm1, %v2528_v38, 0.0 }
0x3459   :  { %2530 = vadd.xlane.f32.xlu0 %v2529_v22 }
0x346f   :  { %2663 = vperm.xlu0 %3340, %v3857_v57   ;;  %v2745_v57 = vld [vmem:[#allocation3 + $0x1f8] ss:$0 sm:$0xff] }
0x34c6   :  { %v2548_v23 = vpop.permute.xlu1 %2547 }
0x34c7   :  { %v2550_v9 = vsel %vm55_vm1, %v2548_v23, 0.0 }
0x34c8   :  { %2551 = vadd.xlane.f32.xlu1 %v2550_v9 }
0x34e6   :  { %v2531_v36 = vpop.xlane.xlu0 %2530 }
0x34e7   :  { %v2532_v39 = vmul.f32 0.03125, %v2531_v36 }
0x34e9   :  { %v2533_v28 = vadd.f32 1e-05, %v2532_v39 }
0x34eb   :  { %3449 = vrsqrt.f32 %v2533_v28 }
0x34ee   :  { %v2664_v60 = vpop.permute.xlu0 %2663 }
0x34f5   :  { %v3450_v32 = vpop.eup %3449 }
0x34f6   :  { %v2535_v43 = vmul.f32 %v3450_v32, %v2527_v21 }
0x3555   :  { %v2552_v40 = vpop.xlane.xlu1 %2551 }
0x3556   :  { %v2553_v41 = vmul.f32 0.03125, %v2552_v40 }
0x3558   :  { %v2554_v42 = vadd.f32 1e-05, %v2553_v41 }
0x355a   :  { %3451 = vrsqrt.f32 %v2554_v42 }
0x3564   :  { %v3452_v37 = vpop.eup %3451 }
0x3565   :  { %v2556_v44 = vmul.f32 %v3452_v37, %v2544_v14 }
0x3567   :  { %v2557_v0 = vsel %vm55_vm1, %v2535_v43, %v2556_v44 }
0x3568   :  { %v2562_v47 = vmul.f32 %v2743_v45, %v2557_v0 }
0x356a   :  { %v2567_v49 = vadd.f32 %v2744_v46, %v2562_v47 }
0x356c   :  { %v2568_v16 = vmax.f32 %v2567_v49, 0.0 }
0x356e   :  { %3161 = vmatmul.mubr.msk.f32.vlgmr.msra.gmra.mrb[24].mxu1 %vm2447_vm6, %v2568_v16 }
0x3641   :  { %v2651_v50 = vpop.f32.mrb[24].mxu1 }
0x3642   :  { %v2652_v51 = vadd.f32 %v2745_v57, %v2651_v50  ;;  %v3162_v53 = vpop.f32.mrb[25].mxu1 }
0x3644   :  { %v2747_v58 = vmul.f32 -1.442695, %v2652_v51 }
0x3646   :  { %3453 = vpow2.f32 %v2747_v58 }
0x3650   :  { %v3454_v20 = vpop.eup %3453 }
0x3651   :  { %v2658_v59 = vadd.f32 1.0, %v3454_v20 }
0x3653   :  { %3455 = vrcp.f32 %v2658_v59 }
0x365d   :  { %v3456_v55 = vpop.eup %3455 }
0x365e   :  { %v2666_v8 = vadd.f32 %v3456_v55, %v2664_v60 }
0x3660   :  { %v2667_v61 = vmax.f32 %v2666_v8, 0.0 }
0x3662   :  { %v2668_v56 = vmin.f32 %v2667_v61, 1.0 }
0x3664   :  { %2670 = vrot.lane.b32.xlu1 %v2668_v56, %s3483_s23 }
0x36d6   :  { %v2671_v62 = vpop.permute.xlu1 %2670 }
0x36d7   :  { %v2673_v10 = vsel %vm2208_vm2, %v3864_v19, %v2671_v62 }
0x36d8   :  { %v2675_v15 = vsel %vm2674_vm7, %v2673_v10, 0.0 }
0x36d9   :  { %2676 = vst [vmem:[%s3908_s3] sm:$0xff] %v2675_v15 }
0x36da   :  { %2681 = vsyncpa [#allocation4], 1 }

</bundles_post_ra>
